<compile_context>
chip_gen: v5e
topology: v5e:2x2
jax: 0.10.0
libtpu: 0.0.40
codegen_flags: <defaults>
</compile_context>

<pallas_src>
import jax
import jax.numpy as jnp
from jax.experimental import pallas as pl
from jax.experimental.pallas import tpu as pltpu


# ----------------------------------------------------------------------------
# Fused UpBlock kernel (one grid step per image, everything resident in VMEM).
# ----------------------------------------------------------------------------
def _make_upblock_kernel(H, W, Cout):
    Ho, Wo = 2 * H, 2 * W
    RW = Wo * Cout  # lane-dense row width of all full-resolution intermediates

    def kernel(x_ref, wupw_ref, bup_ref, uh_ref,
               k1_ref, b1_ref, k2_ref, b2_ref, o_ref):
        bf16, f32 = jnp.bfloat16, jnp.float32

        # 1x1 conv (+ folded BN scale) fused with the W-direction bilinear upsample.
        x = x_ref[0]                                                     # (H, W*Cin)
        z = jnp.dot(x.astype(bf16), wupw_ref[...],
                    preferred_element_type=f32) + bup_ref[...]           # (H, RW)

        # H-direction bilinear upsample (align_corners) as a small f32 matmul, then the
        # up_conv ReLU (exact by linearity: interpolation rows sum to 1, conv1x1+BN is
        # affine, so ReLU(up(affine(x))) == ReLU(affine(up(x)))).
        h0 = jnp.maximum(jnp.dot(uh_ref[...], z,
                                 preferred_element_type=f32), 0.0)       # (Ho, RW)

        def conv3x3_bn(h, k_ref, bias_ref):
            # 3x3 conv + folded BN: one in-VMEM zero row top/bottom (no XLA pad), then
            # contract (kx, cin) in one shot per ky with a banded (RW, RW) bf16 matrix
            # -> 3 MXU matmuls with K = 256 and lane-dense 2-D operands throughout.
            zr = jnp.zeros((1, RW), f32)
            slab = jnp.concatenate([zr, h, zr], axis=0)                  # (Ho+2, RW)
            acc = jnp.zeros((Ho, RW), f32)
            for ky in range(3):                                          # static unroll
                acc = acc + jnp.dot(slab[ky:ky + Ho, :].astype(bf16), k_ref[ky],
                                    preferred_element_type=f32)
            return acc + bias_ref[...]

        # BasicBlock: conv3x3+BN+ReLU -> conv3x3+BN -> (+identity) -> ReLU
        h1 = jnp.maximum(conv3x3_bn(h0, k1_ref, b1_ref), 0.0)
        h2 = jnp.maximum(conv3x3_bn(h1, k2_ref, b2_ref) + h0, 0.0)
        o_ref[0] = h2.astype(o_ref.dtype)

    return kernel


def upblock_forward(x_nchw, ops):
    """Fused UpBlock forward.  x_nchw: (N, Cin, H, W) -> (N, Cout, 2H, 2W)."""
    N, Cin, H, W = x_nchw.shape
    Ho, Wo = 2 * H, 2 * W
    Cout = ops["bup"].shape[1] // Wo
    RW = Wo * Cout

    # NCHW -> channels-last rows (N, H, W*Cin): tiny, low-resolution boundary relayout.
    x_cl = jnp.transpose(x_nchw, (0, 2, 3, 1)).reshape(N, H, W * Cin)

    kernel = _make_upblock_kernel(H, W, Cout)
    out = pl.pallas_call(
        kernel,
        out_shape=jax.ShapeDtypeStruct((N, Ho, RW), x_nchw.dtype),
        grid=(N,),
        in_specs=[
            pl.BlockSpec((1, H, W * Cin), lambda n: (n, 0, 0)),
            pl.BlockSpec((W * Cin, RW), lambda n: (0, 0)),
            pl.BlockSpec((1, RW), lambda n: (0, 0)),
            pl.BlockSpec((Ho, H), lambda n: (0, 0)),
            pl.BlockSpec((3, RW, RW), lambda n: (0, 0, 0)),
            pl.BlockSpec((1, RW), lambda n: (0, 0)),
            pl.BlockSpec((3, RW, RW), lambda n: (0, 0, 0)),
            pl.BlockSpec((1, RW), lambda n: (0, 0)),
        ],
        out_specs=pl.BlockSpec((1, Ho, RW), lambda n: (n, 0, 0)),
        compiler_params=pltpu.CompilerParams(dimension_semantics=("parallel",)),
    )(x_cl, ops["wupw"], ops["bup"], ops["uh"],
      ops["k1"], ops["b1"], ops["k2"], ops["b2"])

    # channels-last -> NCHW at the module boundary (the kernel store itself is lane-dense).
    return jnp.transpose(out.reshape(N, Ho, Wo, Cout), (0, 3, 1, 2))


# ----------------------------------------------------------------------------
# Host-side parameter folding: BN fold + matmul-form operators for the kernel.
# ----------------------------------------------------------------------------
def _interp_matrix(size_in, size_out):
    """align_corners=True bilinear interpolation matrix, shape (size_out, size_in)."""
    scale = (size_in - 1) / (size_out - 1) if size_out > 1 else 0.0
    src = jnp.arange(size_out, dtype=jnp.float32) * scale
    i0 = jnp.clip(jnp.floor(src), 0, size_in - 1).astype(jnp.int32)
    i1 = jnp.minimum(i0 + 1, size_in - 1)
    f = src - i0.astype(jnp.float32)
    rows = jnp.arange(size_out)
    m = jnp.zeros((size_out, size_in), jnp.float32)
    m = m.at[rows, i0].add(1.0 - f)
    m = m.at[rows, i1].add(f)
    return m


def _banded_conv3x3_matrices(w, scale, Wo):
    """(3, Wo*Cin, Wo*Cout) bf16.  B[ky] contracts the (kx, cin) taps of one row-slab
    of a channels-last image in a single matmul; zero padding along W and the folded-BN
    per-channel scale are baked into the band structure."""
    cin, cout = w.shape[2], w.shape[3]
    ws = w * scale[None, None, None, :]                    # (3, 3, Cin, Cout)
    mats = []
    for ky in range(3):
        b = jnp.zeros((Wo * cin, Wo * cout), jnp.float32)
        for kx in range(3):
            shift = jnp.eye(Wo, Wo, k=1 - kx, dtype=jnp.float32)   # xs == x + kx - 1
            b = b + jnp.kron(shift, ws[ky, kx])
        mats.append(b)
    return jnp.stack(mats, 0).astype(jnp.bfloat16)


def fold_bn(gamma, beta, mean, var, eps=1e-5):
    scale = gamma / jnp.sqrt(var + eps)
    return scale, beta - mean * scale


def make_bn_params(key, c):
    k1, k2, k3, k4 = jax.random.split(key, 4)
    gamma = 1.0 + 0.1 * jax.random.normal(k1, (c,), jnp.float32)
    beta = 0.1 * jax.random.normal(k2, (c,), jnp.float32)
    mean = 0.1 * jax.random.normal(k3, (c,), jnp.float32)
    var = 0.5 + jnp.abs(jax.random.normal(k4, (c,), jnp.float32))
    return fold_bn(gamma, beta, mean, var)


def init_upblock_params(key, in_ch, out_ch):
    ks = jax.random.split(key, 6)
    p = {}
    p["w_up"] = 0.2 * jax.random.normal(ks[0], (in_ch, out_ch), jnp.float32)
    p["s_up"], p["b_up"] = make_bn_params(ks[1], out_ch)
    p["w1"] = 0.1 * jax.random.normal(ks[2], (3, 3, out_ch, out_ch), jnp.float32)
    p["s1"], p["b1"] = make_bn_params(ks[3], out_ch)
    p["w2"] = 0.1 * jax.random.normal(ks[4], (3, 3, out_ch, out_ch), jnp.float32)
    p["s2"], p["b2"] = make_bn_params(ks[5], out_ch)
    return p


def fold_upblock_params(params, H, W):
    """Build the (tiny, reusable) matmul operands consumed by the fused kernel."""
    Cin, Cout = params["w_up"].shape
    Ho, Wo = 2 * H, 2 * W
    u_h = _interp_matrix(H, Ho)                            # (Ho, H)
    u_w = _interp_matrix(W, Wo)                            # (Wo, W)
    ws_up = params["w_up"] * params["s_up"][None, :]       # BN scale folded into conv1x1
    return {
        # kron(I_W, ws_up) @ kron(U_w^T, I_Cout) == kron(U_w^T, ws_up)
        "wupw": jnp.kron(u_w.T, ws_up).astype(jnp.bfloat16),      # (W*Cin, Wo*Cout)
        "bup": jnp.tile(params["b_up"], Wo).reshape(1, Wo * Cout),
        "uh": u_h,                                                 # (Ho, H) f32
        "k1": _banded_conv3x3_matrices(params["w1"], params["s1"], Wo),
        "b1": jnp.tile(params["b1"], Wo).reshape(1, Wo * Cout),
        "k2": _banded_conv3x3_matrices(params["w2"], params["s2"], Wo),
        "b2": jnp.tile(params["b2"], Wo).reshape(1, Wo * Cout),
    }


# ----------------------------------------------------------------------------
# Pure-XLA reference (original op order) for a correctness cross-check.
# ----------------------------------------------------------------------------
def _bilinear_upsample_x2_ref(x_nhwc):
    N, H, W, C = x_nhwc.shape
    Ho, Wo = 2 * H, 2 * W

    def coords(size_in, size_out):
        scale = (size_in - 1) / (size_out - 1) if size_out > 1 else 0.0
        src = jnp.arange(size_out, dtype=jnp.float32) * scale
        i0 = jnp.clip(jnp.floor(src), 0, size_in - 1).astype(jnp.int32)
        i1 = jnp.minimum(i0 + 1, size_in - 1)
        f = src - i0.astype(jnp.float32)
        return i0, i1, f

    y0, y1, fy = coords(H, Ho)
    x0, x1, fx = coords(W, Wo)
    rows = (x_nhwc[:, y0, :, :] * (1.0 - fy)[None, :, None, None]
            + x_nhwc[:, y1, :, :] * fy[None, :, None, None])
    return (rows[:, :, x0, :] * (1.0 - fx)[None, None, :, None]
            + rows[:, :, x1, :] * fx[None, None, :, None])


def upblock_reference(x_nchw, params):
    x = jnp.transpose(x_nchw, (0, 2, 3, 1))
    x = _bilinear_upsample_x2_ref(x)
    z = jnp.einsum("nhwc,cd->nhwd", x, params["w_up"]) * params["s_up"] + params["b_up"]
    h0 = jnp.maximum(z, 0.0)

    def conv3(h, w, s, b):
        y = jax.lax.conv_general_dilated(
            h, w, window_strides=(1, 1), padding="SAME",
            dimension_numbers=("NHWC", "HWIO", "NHWC"))
        return y * s + b

    h1 = jnp.maximum(conv3(h0, params["w1"], params["s1"], params["b1"]), 0.0)
    h2 = jnp.maximum(conv3(h1, params["w2"], params["s2"], params["b2"]) + h0, 0.0)
    return jnp.transpose(h2, (0, 3, 1, 2))


if __name__ == "__main__":
    key = jax.random.PRNGKey(0)
    kx, kp = jax.random.split(key)

    N, in_ch, H, W = 2, 4, 16, 16
    out_ch = 8
    x = jax.random.normal(kx, (N, in_ch, H, W), jnp.float32)
    params = init_upblock_params(kp, in_ch, out_ch)
    ops = fold_upblock_params(params, H, W)

    out = jax.jit(upblock_forward)(x, ops)
    out = jax.block_until_ready(out)

    assert out.shape == (N, out_ch, 2 * H, 2 * W), out.shape
    assert bool(jnp.all(jnp.isfinite(out)))
    assert bool(jnp.all(out >= 0.0))  # final ReLU

    # Cross-check against the pure-XLA reference (bf16 conv weights -> loose tolerance).
    ref = upblock_reference(x, params)
    max_err = float(jnp.max(jnp.abs(out - ref)))
    assert max_err < 1e-1, max_err

    print("KERNEL_OK")
</pallas_src>

<mosaic_0001>
module attributes {stable_mosaic.version = 11 : i64} {
  func.func @kernel(%arg0: i32, %arg1: memref<1x16x64xf32, #tpu.memory_space<vmem>>, %arg2: memref<64x256xbf16, #tpu.memory_space<vmem>>, %arg3: memref<1x256xf32, #tpu.memory_space<vmem>>, %arg4: memref<32x16xf32, #tpu.memory_space<vmem>>, %arg5: memref<3x256x256xbf16, #tpu.memory_space<vmem>>, %arg6: memref<1x256xf32, #tpu.memory_space<vmem>>, %arg7: memref<3x256x256xbf16, #tpu.memory_space<vmem>>, %arg8: memref<1x256xf32, #tpu.memory_space<vmem>>, %arg9: memref<1x32x256xf32, #tpu.memory_space<vmem>>) attributes {dimension_semantics = [#tpu.dimension_semantics<parallel>], iteration_bounds = array<i64: 2>, scalar_prefetch = 0 : i64, scratch_operands = 0 : i64, tpu.core_type = #tpu.core_type<tc>, window_params = [{transform_indices = @transform_0, window_bounds = array<i64: 1, 16, 64>}, {pipeline_mode = #tpu.pipeline_mode<synchronous>, transform_indices = @transform_1, window_bounds = array<i64: 64, 256>}, {pipeline_mode = #tpu.pipeline_mode<synchronous>, transform_indices = @transform_2, window_bounds = array<i64: 1, 256>}, {pipeline_mode = #tpu.pipeline_mode<synchronous>, transform_indices = @transform_3, window_bounds = array<i64: 32, 16>}, {pipeline_mode = #tpu.pipeline_mode<synchronous>, transform_indices = @transform_4, window_bounds = array<i64: 3, 256, 256>}, {pipeline_mode = #tpu.pipeline_mode<synchronous>, transform_indices = @transform_5, window_bounds = array<i64: 1, 256>}, {pipeline_mode = #tpu.pipeline_mode<synchronous>, transform_indices = @transform_6, window_bounds = array<i64: 3, 256, 256>}, {pipeline_mode = #tpu.pipeline_mode<synchronous>, transform_indices = @transform_7, window_bounds = array<i64: 1, 256>}, {transform_indices = @transform_8, window_bounds = array<i64: 1, 32, 256>}]} {
    %c0 = arith.constant 0 : index
    %c0_0 = arith.constant 0 : index
    %c0_1 = arith.constant 0 : index
    %0 = vector.load %arg1[%c0, %c0_0, %c0_1] : memref<1x16x64xf32, #tpu.memory_space<vmem>>, vector<1x16x64xf32>
    %1 = vector.shape_cast %0 : vector<1x16x64xf32> to vector<16x64xf32>
    %2 = arith.truncf %1 : vector<16x64xf32> to vector<16x64xbf16>
    %c0_2 = arith.constant 0 : index
    %c0_3 = arith.constant 0 : index
    %3 = vector.load %arg2[%c0_2, %c0_3] : memref<64x256xbf16, #tpu.memory_space<vmem>>, vector<64x256xbf16>
    %cst = arith.constant dense<0.000000e+00> : vector<16x256xf32>
    %4 = tpu.matmul %2, %3, %cst {dimension_numbers = #tpu.dot_dimension_numbers<[1], [0], [0], [1], [0, 0, 1, 1], [], []>} : vector<16x64xbf16>, vector<64x256xbf16>, vector<16x256xf32> -> vector<16x256xf32>
    %c0_4 = arith.constant 0 : index
    %c0_5 = arith.constant 0 : index
    %5 = vector.load %arg3[%c0_4, %c0_5] : memref<1x256xf32, #tpu.memory_space<vmem>>, vector<1x256xf32>
    %6 = vector.broadcast %5 : vector<1x256xf32> to vector<16x256xf32>
    %7 = arith.addf %4, %6 : vector<16x256xf32>
    %c0_6 = arith.constant 0 : index
    %c0_7 = arith.constant 0 : index
    %8 = vector.load %arg4[%c0_6, %c0_7] : memref<32x16xf32, #tpu.memory_space<vmem>>, vector<32x16xf32>
    %cst_8 = arith.constant dense<0.000000e+00> : vector<32x256xf32>
    %9 = tpu.matmul %8, %7, %cst_8 {dimension_numbers = #tpu.dot_dimension_numbers<[1], [0], [0], [1], [0, 0, 1, 1], [], []>} : vector<32x16xf32>, vector<16x256xf32>, vector<32x256xf32> -> vector<32x256xf32>
    %cst_9 = arith.constant 0.000000e+00 : f32
    %10 = vector.broadcast %cst_9 : f32 to vector<32x256xf32>
    %11 = arith.maximumf %9, %10 : vector<32x256xf32>
    %cst_10 = arith.constant 0.000000e+00 : f32
    %12 = vector.broadcast %cst_10 : f32 to vector<1x256xf32>
    %13 = tpu.concatenate %12, %11, %12 in 0 : vector<1x256xf32>, vector<32x256xf32>, vector<1x256xf32> -> vector<34x256xf32>
    %cst_11 = arith.constant 0.000000e+00 : f32
    %14 = vector.broadcast %cst_11 : f32 to vector<32x256xf32>
    %15 = vector.extract_strided_slice %13 {offsets = [0, 0], sizes = [32, 256], strides = [1, 1]} : vector<34x256xf32> to vector<32x256xf32>
    %16 = arith.truncf %15 : vector<32x256xf32> to vector<32x256xbf16>
    %c0_12 = arith.constant 0 : index
    %c0_13 = arith.constant 0 : index
    %c0_14 = arith.constant 0 : index
    %17 = vector.load %arg5[%c0_12, %c0_13, %c0_14] : memref<3x256x256xbf16, #tpu.memory_space<vmem>>, vector<1x256x256xbf16>
    %18 = vector.shape_cast %17 : vector<1x256x256xbf16> to vector<256x256xbf16>
    %cst_15 = arith.constant dense<0.000000e+00> : vector<32x256xf32>
    %19 = tpu.matmul %16, %18, %cst_15 {dimension_numbers = #tpu.dot_dimension_numbers<[1], [0], [0], [1], [0, 0, 1, 1], [], []>} : vector<32x256xbf16>, vector<256x256xbf16>, vector<32x256xf32> -> vector<32x256xf32>
    %20 = arith.addf %14, %19 : vector<32x256xf32>
    %21 = vector.extract_strided_slice %13 {offsets = [1, 0], sizes = [32, 256], strides = [1, 1]} : vector<34x256xf32> to vector<32x256xf32>
    %22 = arith.truncf %21 : vector<32x256xf32> to vector<32x256xbf16>
    %c1 = arith.constant 1 : index
    %c0_16 = arith.constant 0 : index
    %c0_17 = arith.constant 0 : index
    %23 = vector.load %arg5[%c1, %c0_16, %c0_17] : memref<3x256x256xbf16, #tpu.memory_space<vmem>>, vector<1x256x256xbf16>
    %24 = vector.shape_cast %23 : vector<1x256x256xbf16> to vector<256x256xbf16>
    %cst_18 = arith.constant dense<0.000000e+00> : vector<32x256xf32>
    %25 = tpu.matmul %22, %24, %cst_18 {dimension_numbers = #tpu.dot_dimension_numbers<[1], [0], [0], [1], [0, 0, 1, 1], [], []>} : vector<32x256xbf16>, vector<256x256xbf16>, vector<32x256xf32> -> vector<32x256xf32>
    %26 = arith.addf %20, %25 : vector<32x256xf32>
    %27 = vector.extract_strided_slice %13 {offsets = [2, 0], sizes = [32, 256], strides = [1, 1]} : vector<34x256xf32> to vector<32x256xf32>
    %28 = arith.truncf %27 : vector<32x256xf32> to vector<32x256xbf16>
    %c2 = arith.constant 2 : index
    %c0_19 = arith.constant 0 : index
    %c0_20 = arith.constant 0 : index
    %29 = vector.load %arg5[%c2, %c0_19, %c0_20] : memref<3x256x256xbf16, #tpu.memory_space<vmem>>, vector<1x256x256xbf16>
    %30 = vector.shape_cast %29 : vector<1x256x256xbf16> to vector<256x256xbf16>
    %cst_21 = arith.constant dense<0.000000e+00> : vector<32x256xf32>
    %31 = tpu.matmul %28, %30, %cst_21 {dimension_numbers = #tpu.dot_dimension_numbers<[1], [0], [0], [1], [0, 0, 1, 1], [], []>} : vector<32x256xbf16>, vector<256x256xbf16>, vector<32x256xf32> -> vector<32x256xf32>
    %32 = arith.addf %26, %31 : vector<32x256xf32>
    %c0_22 = arith.constant 0 : index
    %c0_23 = arith.constant 0 : index
    %33 = vector.load %arg6[%c0_22, %c0_23] : memref<1x256xf32, #tpu.memory_space<vmem>>, vector<1x256xf32>
    %34 = vector.broadcast %33 : vector<1x256xf32> to vector<32x256xf32>
    %35 = arith.addf %32, %34 : vector<32x256xf32>
    %cst_24 = arith.constant 0.000000e+00 : f32
    %36 = vector.broadcast %cst_24 : f32 to vector<32x256xf32>
    %37 = arith.maximumf %35, %36 : vector<32x256xf32>
    %cst_25 = arith.constant 0.000000e+00 : f32
    %38 = vector.broadcast %cst_25 : f32 to vector<1x256xf32>
    %39 = tpu.concatenate %38, %37, %38 in 0 : vector<1x256xf32>, vector<32x256xf32>, vector<1x256xf32> -> vector<34x256xf32>
    %cst_26 = arith.constant 0.000000e+00 : f32
    %40 = vector.broadcast %cst_26 : f32 to vector<32x256xf32>
    %41 = vector.extract_strided_slice %39 {offsets = [0, 0], sizes = [32, 256], strides = [1, 1]} : vector<34x256xf32> to vector<32x256xf32>
    %42 = arith.truncf %41 : vector<32x256xf32> to vector<32x256xbf16>
    %c0_27 = arith.constant 0 : index
    %c0_28 = arith.constant 0 : index
    %c0_29 = arith.constant 0 : index
    %43 = vector.load %arg7[%c0_27, %c0_28, %c0_29] : memref<3x256x256xbf16, #tpu.memory_space<vmem>>, vector<1x256x256xbf16>
    %44 = vector.shape_cast %43 : vector<1x256x256xbf16> to vector<256x256xbf16>
    %cst_30 = arith.constant dense<0.000000e+00> : vector<32x256xf32>
    %45 = tpu.matmul %42, %44, %cst_30 {dimension_numbers = #tpu.dot_dimension_numbers<[1], [0], [0], [1], [0, 0, 1, 1], [], []>} : vector<32x256xbf16>, vector<256x256xbf16>, vector<32x256xf32> -> vector<32x256xf32>
    %46 = arith.addf %40, %45 : vector<32x256xf32>
    %47 = vector.extract_strided_slice %39 {offsets = [1, 0], sizes = [32, 256], strides = [1, 1]} : vector<34x256xf32> to vector<32x256xf32>
    %48 = arith.truncf %47 : vector<32x256xf32> to vector<32x256xbf16>
    %c1_31 = arith.constant 1 : index
    %c0_32 = arith.constant 0 : index
    %c0_33 = arith.constant 0 : index
    %49 = vector.load %arg7[%c1_31, %c0_32, %c0_33] : memref<3x256x256xbf16, #tpu.memory_space<vmem>>, vector<1x256x256xbf16>
    %50 = vector.shape_cast %49 : vector<1x256x256xbf16> to vector<256x256xbf16>
    %cst_34 = arith.constant dense<0.000000e+00> : vector<32x256xf32>
    %51 = tpu.matmul %48, %50, %cst_34 {dimension_numbers = #tpu.dot_dimension_numbers<[1], [0], [0], [1], [0, 0, 1, 1], [], []>} : vector<32x256xbf16>, vector<256x256xbf16>, vector<32x256xf32> -> vector<32x256xf32>
    %52 = arith.addf %46, %51 : vector<32x256xf32>
    %53 = vector.extract_strided_slice %39 {offsets = [2, 0], sizes = [32, 256], strides = [1, 1]} : vector<34x256xf32> to vector<32x256xf32>
    %54 = arith.truncf %53 : vector<32x256xf32> to vector<32x256xbf16>
    %c2_35 = arith.constant 2 : index
    %c0_36 = arith.constant 0 : index
    %c0_37 = arith.constant 0 : index
    %55 = vector.load %arg7[%c2_35, %c0_36, %c0_37] : memref<3x256x256xbf16, #tpu.memory_space<vmem>>, vector<1x256x256xbf16>
    %56 = vector.shape_cast %55 : vector<1x256x256xbf16> to vector<256x256xbf16>
    %cst_38 = arith.constant dense<0.000000e+00> : vector<32x256xf32>
    %57 = tpu.matmul %54, %56, %cst_38 {dimension_numbers = #tpu.dot_dimension_numbers<[1], [0], [0], [1], [0, 0, 1, 1], [], []>} : vector<32x256xbf16>, vector<256x256xbf16>, vector<32x256xf32> -> vector<32x256xf32>
    %58 = arith.addf %52, %57 : vector<32x256xf32>
    %c0_39 = arith.constant 0 : index
    %c0_40 = arith.constant 0 : index
    %59 = vector.load %arg8[%c0_39, %c0_40] : memref<1x256xf32, #tpu.memory_space<vmem>>, vector<1x256xf32>
    %60 = vector.broadcast %59 : vector<1x256xf32> to vector<32x256xf32>
    %61 = arith.addf %58, %60 : vector<32x256xf32>
    %62 = arith.addf %61, %11 : vector<32x256xf32>
    %cst_41 = arith.constant 0.000000e+00 : f32
    %63 = vector.broadcast %cst_41 : f32 to vector<32x256xf32>
    %64 = arith.maximumf %62, %63 : vector<32x256xf32>
    %c0_42 = arith.constant 0 : index
    %c0_43 = arith.constant 0 : index
    %c0_44 = arith.constant 0 : index
    %65 = vector.load %arg9[%c0_42, %c0_43, %c0_44] : memref<1x32x256xf32, #tpu.memory_space<vmem>>, vector<1x32x256xf32>
    %66 = vector.shape_cast %65 : vector<1x32x256xf32> to vector<32x256xf32>
    %67 = vector.shape_cast %64 : vector<32x256xf32> to vector<1x32x256xf32>
    tpu.vector_store %arg9[%c0_42, %c0_43, %c0_44], %67 {strides = array<i32>} : memref<1x32x256xf32, #tpu.memory_space<vmem>>, vector<1x32x256xf32>,
    return
  }
  func.func @transform_0(%arg0: i32) -> (i32, i32, i32) {
    %c0_i32 = arith.constant 0 : i32
    %c0_i32_0 = arith.constant 0 : i32
    %c0_i32_1 = arith.constant 0 : i32
    return %arg0, %c0_i32, %c0_i32_0 : i32, i32, i32
  }
  func.func @transform_1(%arg0: i32) -> (i32, i32) {
    %c0_i32 = arith.constant 0 : i32
    %c0_i32_0 = arith.constant 0 : i32
    %c0_i32_1 = arith.constant 0 : i32
    return %c0_i32, %c0_i32_0 : i32, i32
  }
  func.func @transform_2(%arg0: i32) -> (i32, i32) {
    %c0_i32 = arith.constant 0 : i32
    %c0_i32_0 = arith.constant 0 : i32
    %c0_i32_1 = arith.constant 0 : i32
    return %c0_i32, %c0_i32_0 : i32, i32
  }
  func.func @transform_3(%arg0: i32) -> (i32, i32) {
    %c0_i32 = arith.constant 0 : i32
    %c0_i32_0 = arith.constant 0 : i32
    %c0_i32_1 = arith.constant 0 : i32
    return %c0_i32, %c0_i32_0 : i32, i32
  }
  func.func @transform_4(%arg0: i32) -> (i32, i32, i32) {
    %c0_i32 = arith.constant 0 : i32
    %c0_i32_0 = arith.constant 0 : i32
    %c0_i32_1 = arith.constant 0 : i32
    %c0_i32_2 = arith.constant 0 : i32
    return %c0_i32, %c0_i32_0, %c0_i32_1 : i32, i32, i32
  }
  func.func @transform_5(%arg0: i32) -> (i32, i32) {
    %c0_i32 = arith.constant 0 : i32
    %c0_i32_0 = arith.constant 0 : i32
    %c0_i32_1 = arith.constant 0 : i32
    return %c0_i32, %c0_i32_0 : i32, i32
  }
  func.func @transform_6(%arg0: i32) -> (i32, i32, i32) {
    %c0_i32 = arith.constant 0 : i32
    %c0_i32_0 = arith.constant 0 : i32
    %c0_i32_1 = arith.constant 0 : i32
    %c0_i32_2 = arith.constant 0 : i32
    return %c0_i32, %c0_i32_0, %c0_i32_1 : i32, i32, i32
  }
  func.func @transform_7(%arg0: i32) -> (i32, i32) {
    %c0_i32 = arith.constant 0 : i32
    %c0_i32_0 = arith.constant 0 : i32
    %c0_i32_1 = arith.constant 0 : i32
    return %c0_i32, %c0_i32_0 : i32, i32
  }
  func.func @transform_8(%arg0: i32) -> (i32, i32, i32) {
    %c0_i32 = arith.constant 0 : i32
    %c0_i32_0 = arith.constant 0 : i32
    %c0_i32_1 = arith.constant 0 : i32
    return %arg0, %c0_i32, %c0_i32_0 : i32, i32, i32
  }
}

</mosaic_0001>

<bundles_post_ra>
// kernel: upblock_forward.1
= control target key start
LH: loop header
LB: loop body
LE: loop exit
PB: predicated region body
PF: predicated region fallthrough
CT: control target
= control target key end

     0   :  { %13 = vsyncpa [#allocation3], 0  ;;  %s4236_s0 = inlined_call_operand.vmem [shape: f32[2,16,64], index: 0, kind: input, shape index: {}]   ;;  %s4237_s1 = inlined_call_operand.vmem [shape: bf16[64,256], index: 1, kind: input, shape index: {}]   ;;  %s4238_s2 = inlined_call_operand.vmem [shape: f32[1,256], index: 2, kind: input, shape index: {}]   ;;  %s4239_s3 = inlined_call_operand.vmem [shape: f32[32,16], index: 3, kind: input, shape index: {}]   ;;  %s4240_s4 = inlined_call_operand.hbm [shape: bf16[3,256,256], index: 4, kind: input, shape index: {}]   ;;  %s4241_s5 = inlined_call_operand.vmem [shape: f32[1,256], index: 5, kind: input, shape index: {}]   ;;  %s4242_s6 = inlined_call_operand.hbm [shape: bf16[3,256,256], index: 6, kind: input, shape index: {}]   ;;  %s4243_s7 = inlined_call_operand.vmem [shape: f32[1,256], index: 7, kind: input, shape index: {}]   ;;  %s4244_s8 = inlined_call_operand.vmem [shape: f32[2,32,256], index: 8, kind: output, shape index: {}]  }
   0x1   :  { %14 = vsyncpa [#allocation5], 0  ;;  %s3710_s27 = smov 0  }
   0x2 LB: > { %s244_s30 = sshll.u32 %s4240_s4, 4  ;;  %s2493_s9 = sadd.s32 4294967295, %s3658_s27   ;;  %s3658_s27 = sphi %s3710_s27, %s20_s27   ;;  %s245_s30 = int_to_ptr.hbm [resolvable:$true] %s244_s30 }
   0x3   : > { %p2495_p0 = scmp.ge.s32.totalorder %s3658_s27, 1  ;;  %p224_p1 = scmp.lt.s32.totalorder %s3658_s27, 3 }
   0x4   : > { %p3567_p2 = scmp.eq.s32.totalorder %s2493_s9, 0  ;;  %s3660_s11 = smov [#allocation2]  }
   0x5   : > { %p3721_p3 = pnand %p2495_p0, %p224_p1  ;;  %s246_s12 = sshll.u32 %s3660_s11, 4  ;;  %s247_s12 = int_to_ptr.vmem [resolvable:$true] %s246_s12 }
   0x6   : > { %s261_s15 = sshll.u32 %s4242_s6, 4  ;;  %s3661_s16 = smov [#allocation4]   ;;  %s262_s15 = int_to_ptr.hbm [resolvable:$true] %s261_s15 }
   0x7   : > { %p3560_p4 = pneg %p3721_p3  ;;  %s263_s17 = sshll.u32 %s3661_s16, 4  ;;  %s264_s17 = int_to_ptr.vmem [resolvable:$true] %s263_s17 }
   0x8   : > { %s3662_s18 = smov 128   ;;  %s3663_s19 = smov 8  }
   0x9   : > { %p3561_p5 = pnand %p3567_p2, %p3560_p4  ;;  %290 = sbr.rel (%p3721_p3) target bundleno = 813 (0x32d), region = 52 }
   0xb   : > { %3563 = dma.hbm_to_vmem [thread:$0]  (!%p3561_p5), %s245_s30, 12288, %s247_s12, [#allocation3], %s3662_s18, %s3662_s18, %s3663_s19  }
   0xc   : > { %3566 = dma.hbm_to_vmem [thread:$0]  (!%p3561_p5), %s262_s15, 12288, %s264_s17, [#allocation5], %s3662_s18, %s3662_s18, %s3663_s19  }
   0xe   : > { %3649 = dma.done.wait (%p3567_p2), [#allocation3], 12288  }
   0xf   : > { %3651 = vsyncadd (%p3567_p2), [#allocation3], 4294955008 }
  0x10   : > { %3653 = dma.done.wait (%p3567_p2), [#allocation5], 12288  }
  0x11   : > { %3655 = vsyncadd (%p3567_p2), [#allocation5], 4294955008  ;;  %p330_p6 = scmp.lt.s32.totalorder %s2493_s9, 1  ;;  %v2532_v0 = vld [vmem:[%s4237_s1 + $0x30] sm:$0xf]  ;;  %vm398_vm0 = vcmask 523264  }
  0x12   : > { %v3359_v1 = vld [vmem:[%s4237_s1 + $0x34] sm:$0xf0]  ;;  %v3358_v2 = vld [vmem:[%s4237_s1 + $0x34] sm:$0xf]  ;;  %v2534_v4 = vld [vmem:[%s4237_s1 + $0x38] sm:$0xf0] }
  0x13   : > { %s4251_s9 = smov (!%p330_p6, %s2493_s9), 1  ;;  %v2533_v3 = vor.u32 %v3359_v1, %v2532_v0  ;;  %v2524_v5 = vld [vmem:[%s4237_s1 + $0x20] sm:$0xf]  ;;  %v3357_v6 = vld [vmem:[%s4237_s1 + $0x24] sm:$0xf0]  ;;  %v2537_v7 = vor.u32 %v3358_v2, %v2534_v4  ;;  %vm434_vm1 = vcmask 130048  }
  0x14   : > { %v3356_v8 = vld [vmem:[%s4237_s1 + $0x24] sm:$0xf]  ;;  %v2526_v9 = vld [vmem:[%s4237_s1 + $0x28] sm:$0xf0]  ;;  %v2525_v10 = vor.u32 %v3357_v6, %v2524_v5  ;;  %v2516_v12 = vld [vmem:[%s4237_s1 + $0x10] sm:$0xf] }
  0x15   : > { %406 = vmatpush.bf16.msra.mxu0 %v2533_v3  ;;  %420 = vmatpush.bf16.msra.mxu1 %v2537_v7  ;;  %v2529_v11 = vor.u32 %v3356_v8, %v2526_v9  ;;  %v3355_v13 = vld [vmem:[%s4237_s1 + $0x14] sm:$0xf0]  ;;  %v3354_v14 = vld [vmem:[%s4237_s1 + $0x14] sm:$0xf]  ;;  %v2518_v15 = vld [vmem:[%s4237_s1 + $0x18] sm:$0xf0] }
  0x16   : > { %s3350_s24 = sshll.u32 %s4251_s9, 4  ;;  %v2517_v16 = vor.u32 %v3355_v13, %v2516_v12  ;;  %v2521_v17 = vor.u32 %v3354_v14, %v2518_v15  ;;  %v2508_v18 = vld [vmem:[%s4237_s1] sm:$0xf]  ;;  %v3353_v19 = vld [vmem:[%s4237_s1 + $0x4] sm:$0xf0]  ;;  %v432_v40 = vld [vmem:[%s4239_s3 + $0x10] sm:$0xff] }
  0x17   : > { %s334_s11 = scalar_lea.vmem %s4236_s0, %s3350_s24  ;;  %v3352_v20 = vld [vmem:[%s4237_s1 + $0x4] sm:$0xf]  ;;  %v2510_v21 = vld [vmem:[%s4237_s1 + $0x8] sm:$0xf0]  ;;  %v2509_v22 = vor.u32 %v3353_v19, %v2508_v18  ;;  %v352_v29 = vld [vmem:[%s4238_s2] sm:$0x3] }
  0x18   : > { %v341_v23 = vld [vmem:[%s334_s11] sm:$0xff]  ;;  %v342_v24 = vld [vmem:[%s334_s11 + $0x8] sm:$0xff]  ;;  %v2513_v25 = vor.u32 %v3352_v20, %v2510_v21  ;;  %v354_v30 = vperm.slane %v352_v29, 0  ;;  %v355_v31 = vperm.slane %v352_v29, 1  ;;  %v433_v41 = vld [vmem:[%s4239_s3 + $0x18] sm:$0xff]  ;;  %vm521_vm2 = vcmask 1040384  }
  0x19   : > { %407 = vmatpush.bf16.msra.mxu0 %v2525_v10  ;;  %421 = vmatpush.bf16.msra.mxu1 %v2529_v11  ;;  %v343_v26 = vpack.c.bf16 %v342_v24, %v341_v23  ;;  %v430_v37 = vld [vmem:[%s4239_s3] sm:$0xff]  ;;  %v431_v39 = vld [vmem:[%s4239_s3 + $0x8] sm:$0xff]  ;;  %v2606_v42 = vld [vmem:[#allocation2 + $0x170] sm:$0xf]  ;;  %vm621_vm3 = vsmask.f32 7424 }
  0x1a   : > { %v3407_v43 = vld [vmem:[#allocation2 + $0x174] sm:$0xf0]  ;;  %v2670_v44 = vld [vmem:[#allocation2 + $0x1f0] sm:$0xf]  ;;  %v3406_v47 = vld [vmem:[#allocation2 + $0x174] sm:$0xf] }
  0x1b   : > { %v2607_v45 = vor.u32 %v3407_v43, %v2606_v42  ;;  %v3423_v46 = vld [vmem:[#allocation2 + $0x1f4] sm:$0xf0]  ;;  %v2608_v48 = vld [vmem:[#allocation2 + $0x178] sm:$0xf0]  ;;  %v3422_v51 = vld [vmem:[#allocation2 + $0x1f4] sm:$0xf] }
  0x1c   : > { %v2671_v49 = vor.u32 %v3423_v46, %v2670_v44  ;;  %v2611_v50 = vor.u32 %v3406_v47, %v2608_v48  ;;  %v2672_v52 = vld [vmem:[#allocation2 + $0x1f8] sm:$0xf0]  ;;  %v2598_v54 = vld [vmem:[#allocation2 + $0x160] sm:$0xf]  ;;  %v3405_v55 = vld [vmem:[#allocation2 + $0x164] sm:$0xf0] }
  0x1d   : > { %408 = vmatpush.bf16.msra.mxu0 %v2517_v16  ;;  %422 = vmatpush.bf16.msra.mxu1 %v2521_v17  ;;  %v2675_v53 = vor.u32 %v3422_v51, %v2672_v52  ;;  %v2662_v56 = vld [vmem:[#allocation2 + $0x1e0] sm:$0xf]  ;;  %v2599_v57 = vor.u32 %v3405_v55, %v2598_v54  ;;  %v3421_v58 = vld [vmem:[#allocation2 + $0x1e4] sm:$0xf0]  ;;  %v3404_v59 = vld [vmem:[#allocation2 + $0x164] sm:$0xf] }
  0x1e   : > { %v2600_v60 = vld [vmem:[#allocation2 + $0x168] sm:$0xf0]  ;;  %v2663_v61 = vor.u32 %v3421_v58, %v2662_v56  ;;  %v3420_v63 = vld [vmem:[#allocation2 + $0x1e4] sm:$0xf]  ;;  %v2590_v2 = vld [vmem:[#allocation2 + $0x150] sm:$0xf] }
  0x1f   : > { %v2603_v62 = vor.u32 %v3404_v59, %v2600_v60  ;;  %v2664_v0 = vld [vmem:[#allocation2 + $0x1e8] sm:$0xf0]  ;;  %v3403_v3 = vld [vmem:[#allocation2 + $0x154] sm:$0xf0]  ;;  %v2654_v4 = vld [vmem:[#allocation2 + $0x1d0] sm:$0xf] }
  0x20   : > { %v2667_v1 = vor.u32 %v3420_v63, %v2664_v0  ;;  %v2591_v5 = vor.u32 %v3403_v3, %v2590_v2  ;;  %v3419_v6 = vld [vmem:[#allocation2 + $0x1d4] sm:$0xf0]  ;;  %v3402_v7 = vld [vmem:[#allocation2 + $0x154] sm:$0xf]  ;;  %v2592_v8 = vld [vmem:[#allocation2 + $0x158] sm:$0xf0] }
  0x21   : > { %409 = vmatpush.bf16.msra.mxu0 %v2509_v22  ;;  %423 = vmatpush.bf16.msra.mxu1 %v2513_v25  ;;  %v2655_v9 = vor.u32 %v3419_v6, %v2654_v4  ;;  %v2595_v10 = vor.u32 %v3402_v7, %v2592_v8  ;;  %v3418_v11 = vld [vmem:[#allocation2 + $0x1d4] sm:$0xf]  ;;  %v2656_v12 = vld [vmem:[#allocation2 + $0x1d8] sm:$0xf0]  ;;  %v2582_v14 = vld [vmem:[#allocation2 + $0x140] sm:$0xf] }
  0x22   : > { %v2659_v13 = vor.u32 %v3418_v11, %v2656_v12  ;;  %v3401_v15 = vld [vmem:[#allocation2 + $0x144] sm:$0xf0]  ;;  %v2646_v16 = vld [vmem:[#allocation2 + $0x1c0] sm:$0xf]  ;;  %v3400_v19 = vld [vmem:[#allocation2 + $0x144] sm:$0xf] }
  0x23   : > { %v2583_v17 = vor.u32 %v3401_v15, %v2582_v14  ;;  %v3417_v18 = vld [vmem:[#allocation2 + $0x1c4] sm:$0xf0]  ;;  %v2584_v20 = vld [vmem:[#allocation2 + $0x148] sm:$0xf0]  ;;  %v3416_v23 = vld [vmem:[#allocation2 + $0x1c4] sm:$0xf] }
  0x24   : > { %2538 = vmatmul.msk.bf16.vlgmr.msra.gmra.mxu0 %vm398_vm0, %v343_v26  ;;  %2539 = vmatmul.msk.bf16.vlgmr.msra.gmra.mxu1 %vm398_vm0, %v343_v26  ;;  %v2647_v21 = vor.u32 %v3417_v18, %v2646_v16  ;;  %v2587_v22 = vor.u32 %v3400_v19, %v2584_v20  ;;  %v2648_v24 = vld [vmem:[#allocation2 + $0x1c8] sm:$0xf0]  ;;  %v2574_v26 = vld [vmem:[#allocation2 + $0x130] sm:$0xf]  ;;  %v3413_v42 = vld [vmem:[#allocation2 + $0x1a4] sm:$0xf0] }
  0x25   : > { %864 = vmatpush.bf16.msrb.mxu0 %v2611_v50  ;;  %883 = vmatpush.bf16.msrb.mxu1 %v2675_v53  ;;  %v2651_v25 = vor.u32 %v3416_v23, %v2648_v24  ;;  %v3396_v43 = vld [vmem:[#allocation2 + $0x124] sm:$0xf]  ;;  %v2568_v44 = vld [vmem:[#allocation2 + $0x128] sm:$0xf0]  ;;  %v2558_v50 = vld [vmem:[#allocation2 + $0x110] sm:$0xf] }
  0x26   : > { %v2571_v46 = vor.u32 %v3396_v43, %v2568_v44  ;;  %v3412_v47 = vld [vmem:[#allocation2 + $0x1a4] sm:$0xf]  ;;  %v2632_v48 = vld [vmem:[#allocation2 + $0x1a8] sm:$0xf0]  ;;  %v3395_v51 = vld [vmem:[#allocation2 + $0x114] sm:$0xf0] }
  0x27   : > { %v2622_v52 = vld [vmem:[#allocation2 + $0x190] sm:$0xf]  ;;  %v2559_v53 = vor.u32 %v3395_v51, %v2558_v50  ;;  %v3411_v54 = vld [vmem:[#allocation2 + $0x194] sm:$0xf0]  ;;  %v3394_v55 = vld [vmem:[#allocation2 + $0x114] sm:$0xf] }
  0x28   : > { %v2560_v56 = vld [vmem:[#allocation2 + $0x118] sm:$0xf0]  ;;  %v3410_v59 = vld [vmem:[#allocation2 + $0x194] sm:$0xf]  ;;  %v3393_v63 = vld [vmem:[#allocation2 + $0x104] sm:$0xf0] }
  0x29   : > { %865 = vmatpush.bf16.msrb.mxu0 %v2603_v62  ;;  %884 = vmatpush.bf16.msrb.mxu1 %v2667_v1  ;;  %v2563_v58 = vor.u32 %v3394_v55, %v2560_v56  ;;  %v2624_v60 = vld [vmem:[#allocation2 + $0x198] sm:$0xf0]  ;;  %v2550_v62 = vld [vmem:[#allocation2 + $0x100] sm:$0xf]  ;;  %v3409_v3 = vld [vmem:[#allocation2 + $0x184] sm:$0xf0] }
  0x2a   : > { %v2614_v0 = vld [vmem:[#allocation2 + $0x180] sm:$0xf]  ;;  %v2551_v2 = vor.u32 %v3393_v63, %v2550_v62  ;;  %v3392_v4 = vld [vmem:[#allocation2 + $0x104] sm:$0xf]  ;;  %v2734_v14 = vld [vmem:[#allocation2 + $0x70] sm:$0xf] }
  0x2b   : > { %v2615_v7 = vor.u32 %v3409_v3, %v2614_v0  ;;  %v3375_v15 = vld [vmem:[#allocation2 + $0x74] sm:$0xf0]  ;;  %v2736_v23 = vld [vmem:[#allocation2 + $0x78] sm:$0xf0]  ;;  %v2782_v51 = vld [vmem:[#allocation2 + $0xd0] sm:$0xf] }
  0x2c   : > { %v2735_v16 = vor.u32 %v3375_v15, %v2734_v14  ;;  %v3391_v18 = vld [vmem:[#allocation2 + $0xf4] sm:$0xf0]  ;;  %v3370_v55 = vld [vmem:[#allocation2 + $0x54] sm:$0xf]  ;;  %v2720_v56 = vld [vmem:[#allocation2 + $0x58] sm:$0xf0] }
  0x2d   : > { %866 = vmatpush.bf16.msrb.mxu0 %v2595_v10  ;;  %885 = vmatpush.bf16.msrb.mxu1 %v2659_v13  ;;  %v2616_v10 = vld [vmem:[#allocation2 + $0x188] sm:$0xf0]  ;;  %v3369_v62 = vld [vmem:[#allocation2 + $0x44] sm:$0xf0]  ;;  %v2774_v3 = vld [vmem:[#allocation2 + $0xc0] sm:$0xf] }
  0x2e   : > { %vm1177_vm4 = vcmask 1046528   ;;  %vm2804_vm5 = vmneg %vm521_vm2  ;;  %vm3664_vm6 = vmmov 1   ;;  %s3351_s10 = sshll.u32 %s4251_s9, 6 }
  0x2f   : > { %vm3933_vm7 = vmpackc.low %vm3664_vm6, %vm2804_vm5  ;;  %s4192_s13 = scalar_lea.vmem %s4244_s8, %s3351_s10 }
  0x31   : > { %867 = vmatpush.bf16.msrb.mxu0 %v2587_v22  ;;  %886 = vmatpush.bf16.msrb.mxu1 %v2651_v25  ;;  %v3374_v22 = vld [vmem:[#allocation2 + $0x74] sm:$0xf] }
  0x32   : > { %v2739_v24 = vor.u32 %v3374_v22, %v2736_v23  ;;  %v3390_v25 = vld [vmem:[#allocation2 + $0xf4] sm:$0xf] }
  0xa1   : > { %v411_v27 = vpop.f32.mrf.mxu0  ;;  %v425_v28 = vpop.f32.mrf.mxu1 }
  0xa2   : > { %v412_v36 = vadd.f32 %v411_v27, %v354_v30  ;;  %v426_v38 = vadd.f32 %v425_v28, %v355_v31  ;;  %v3399_v27 = vld [vmem:[#allocation2 + $0x134] sm:$0xf0]  ;;  %v2638_v28 = vld [vmem:[#allocation2 + $0x1b0] sm:$0xf] }
  0xa3   : > { %v2575_v29 = vor.u32 %v3399_v27, %v2574_v26  ;;  %v2800_v26 = vld [vmem:[#allocation2 + $0xf8] sm:$0xf0]  ;;  %v2726_v27 = vld [vmem:[#allocation2 + $0x60] sm:$0xf] }
  0xa9   : > { %v413_v32 = vpop.f32.mrf.mxu0  ;;  %v427_v33 = vpop.f32.mrf.mxu1 }
  0xaa   : > { %v414_v34 = vadd.f32 %v413_v32, %v354_v30  ;;  %v428_v35 = vadd.f32 %v427_v33, %v355_v31  ;;  %v3415_v30 = vld [vmem:[#allocation2 + $0x1b4] sm:$0xf0]  ;;  %v3398_v31 = vld [vmem:[#allocation2 + $0x134] sm:$0xf]  ;;  %v2576_v32 = vld [vmem:[#allocation2 + $0x138] sm:$0xf0] }
  0xab   : > { %v2639_v33 = vor.u32 %v3415_v30, %v2638_v28  ;;  %v3373_v30 = vld [vmem:[#allocation2 + $0x64] sm:$0xf0] }
  0xac   : > { %461 = vmatpush.msra.mxu2 %v414_v34  ;;  %490 = vmatpush.msra.mxu3 %v428_v35  ;;  %v2579_v34 = vor.u32 %v3398_v31, %v2576_v32  ;;  %v3414_v35 = vld [vmem:[#allocation2 + $0x1b4] sm:$0xf]  ;;  %v2790_v31 = vld [vmem:[#allocation2 + $0xe0] sm:$0xf]  ;;  %v3389_v32 = vld [vmem:[#allocation2 + $0xe4] sm:$0xf0] }
  0xae   : > { %462 = vmatpush.msra.mxu2 %v412_v36  ;;  %491 = vmatpush.msra.mxu3 %v426_v38  ;;  %v2640_v36 = vld [vmem:[#allocation2 + $0x1b8] sm:$0xf0]  ;;  %v2566_v38 = vld [vmem:[#allocation2 + $0x120] sm:$0xf] }
  0xaf   : > { %2540 = vmatmul.msk.f32.vlgmr.msra.gmra.mxu2 %vm434_vm1, %v430_v37  ;;  %2544 = vmatmul.msk.f32.vlgmr.msra.gmra.mxu3 %vm434_vm1, %v430_v37  ;;  %v2643_v37 = vor.u32 %v3414_v35, %v2640_v36  ;;  %v2727_v35 = vor.u32 %v3373_v30, %v2726_v27  ;;  %v2791_v36 = vor.u32 %v3389_v32, %v2790_v31  ;;  %v3383_v30 = vld [vmem:[#allocation2 + $0xb4] sm:$0xf0]  ;;  %v3366_v31 = vld [vmem:[#allocation2 + $0x34] sm:$0xf] }
  0xb0   : > { %826 = vmatpush.bf16.msrb.mxu2 %v2607_v45  ;;  %845 = vmatpush.bf16.msrb.mxu3 %v2671_v49  ;;  %v2635_v49 = vor.u32 %v3412_v47, %v2632_v48  ;;  %v3371_v47 = vld [vmem:[#allocation2 + $0x54] sm:$0xf0] }
  0xb1   : > { %868 = vmatpush.bf16.msrb.mxu0 %v2579_v34  ;;  %887 = vmatpush.bf16.msrb.mxu1 %v2643_v37  ;;  %v3372_v37 = vld [vmem:[#allocation2 + $0x64] sm:$0xf] }
  0xb4   : > { %827 = vmatpush.bf16.msrb.mxu2 %v2599_v57  ;;  %846 = vmatpush.bf16.msrb.mxu3 %v2663_v61  ;;  %v2623_v57 = vor.u32 %v3411_v54, %v2622_v52  ;;  %v2627_v61 = vor.u32 %v3410_v59, %v2624_v60  ;;  %v3387_v52 = vld [vmem:[#allocation2 + $0xd4] sm:$0xf0]  ;;  %v2723_v59 = vor.u32 %v3370_v55, %v2720_v56  ;;  %v2784_v60 = vld [vmem:[#allocation2 + $0xd8] sm:$0xf0] }
  0xb5   : > { %869 = vmatpush.bf16.msrb.mxu0 %v2571_v46  ;;  %888 = vmatpush.bf16.msrb.mxu1 %v2635_v49  ;;  %v2718_v46 = vld [vmem:[#allocation2 + $0x50] sm:$0xf]  ;;  %v2783_v54 = vor.u32 %v3387_v52, %v2782_v51 }
  0xb6   : > { %v2719_v50 = vor.u32 %v3371_v47, %v2718_v46  ;;  %v3381_v47 = vld [vmem:[#allocation2 + $0xa4] sm:$0xf0] }
  0xb7   : > { %2541 = vmatmul.msk.f32.gmra.mxu2 %vm434_vm1, %v431_v39  ;;  %2545 = vmatmul.msk.f32.gmra.mxu3 %vm434_vm1, %v431_v39  ;;  %v3397_v39 = vld [vmem:[#allocation2 + $0x124] sm:$0xf0] }
  0xb8   : > { %828 = vmatpush.bf16.msrb.mxu2 %v2591_v5  ;;  %847 = vmatpush.bf16.msrb.mxu3 %v2655_v9  ;;  %v2552_v5 = vld [vmem:[#allocation2 + $0x108] sm:$0xf0]  ;;  %v3408_v9 = vld [vmem:[#allocation2 + $0x184] sm:$0xf] }
  0xb9   : > { %870 = vmatpush.bf16.msrb.mxu0 %v2563_v58  ;;  %889 = vmatpush.bf16.msrb.mxu1 %v2627_v61  ;;  %v2555_v8 = vor.u32 %v3392_v4, %v2552_v5  ;;  %v2619_v13 = vor.u32 %v3408_v9, %v2616_v10  ;;  %v2710_v61 = vld [vmem:[#allocation2 + $0x40] sm:$0xf]  ;;  %v3385_v4 = vld [vmem:[#allocation2 + $0xc4] sm:$0xf0]  ;;  %v3368_v5 = vld [vmem:[#allocation2 + $0x44] sm:$0xf] }
  0xba   : > { %v2775_v9 = vor.u32 %v3385_v4, %v2774_v3  ;;  %v2712_v10 = vld [vmem:[#allocation2 + $0x48] sm:$0xf0] }
  0xbb   : > { %v2715_v15 = vor.u32 %v3368_v5, %v2712_v10  ;;  %v3379_v10 = vld [vmem:[#allocation2 + $0x94] sm:$0xf0] }
  0xbc   : > { %829 = vmatpush.bf16.msrb.mxu2 %v2583_v17  ;;  %848 = vmatpush.bf16.msrb.mxu3 %v2647_v21  ;;  %v2798_v17 = vld [vmem:[#allocation2 + $0xf0] sm:$0xf] }
  0xbd   : > { %871 = vmatpush.bf16.msrb.mxu0 %v2555_v8  ;;  %890 = vmatpush.bf16.msrb.mxu1 %v2619_v13  ;;  %v2799_v21 = vor.u32 %v3391_v18, %v2798_v17  ;;  %v3384_v13 = vld [vmem:[#allocation2 + $0xc4] sm:$0xf] }
  0xbf   : > { %2542 = vmatmul.msk.f32.gmra.mxu2 %vm434_vm1, %v432_v40  ;;  %2546 = vmatmul.msk.f32.gmra.mxu3 %vm434_vm1, %v432_v40  ;;  %v2630_v40 = vld [vmem:[#allocation2 + $0x1a0] sm:$0xf] }
  0xc0   : > { %830 = vmatpush.bf16.msrb.mxu2 %v2575_v29  ;;  %849 = vmatpush.bf16.msrb.mxu3 %v2639_v33  ;;  %v2631_v45 = vor.u32 %v3413_v42, %v2630_v40  ;;  %v2803_v29 = vor.u32 %v3390_v25, %v2800_v26  ;;  %v2792_v42 = vld [vmem:[#allocation2 + $0xe8] sm:$0xf0]  ;;  %v2702_v25 = vld [vmem:[#allocation2 + $0x30] sm:$0xf]  ;;  %v3367_v26 = vld [vmem:[#allocation2 + $0x34] sm:$0xf0] }
  0xc1   : > { %1100 = vmatpush.bf16.msra.mxu0 %v2739_v24  ;;  %v2703_v27 = vor.u32 %v3367_v26, %v2702_v25  ;;  %v2688_v25 = vld [vmem:[#allocation2 + $0x18] sm:$0xf0] }
  0xc2   : > { %1119 = vmatpush.bf16.msra.mxu1 %v2803_v29  ;;  %v2766_v29 = vld [vmem:[#allocation2 + $0xb0] sm:$0xf] }
  0xc3   : > { %v2767_v32 = vor.u32 %v3383_v30, %v2766_v29  ;;  %v3378_v30 = vld [vmem:[#allocation2 + $0x94] sm:$0xf] }
  0xc4   : > { %850 = vmatpush.bf16.msrb.mxu3 %v2631_v45 }
  0xc7   : > { %2543 = vmatmul.msk.f32.gmra.mxu2 %vm434_vm1, %v433_v41  ;;  %2547 = vmatmul.msk.f32.gmra.mxu3 %vm434_vm1, %v433_v41  ;;  %v2567_v41 = vor.u32 %v3397_v39, %v2566_v38  ;;  %v2728_v38 = vld [vmem:[#allocation2 + $0x68] sm:$0xf0] }
  0xc8   : > { %851 = vmatpush.bf16.msrb.mxu3 %v2623_v57  ;;  %v2731_v40 = vor.u32 %v3372_v37, %v2728_v38  ;;  %v3386_v57 = vld [vmem:[#allocation2 + $0xd4] sm:$0xf]  ;;  %v2768_v37 = vld [vmem:[#allocation2 + $0xb8] sm:$0xf0] }
  0xc9   : > { %831 = vmatpush.bf16.msrb.mxu2 %v2567_v41  ;;  %v3388_v41 = vld [vmem:[#allocation2 + $0xe4] sm:$0xf]  ;;  %v2787_v0 = vor.u32 %v3386_v57, %v2784_v60 }
  0xca   : > { %v2795_v45 = vor.u32 %v3388_v41, %v2792_v42  ;;  %1101 = vmatpush.bf16.msra.mxu0 %v2731_v40  ;;  %v2694_v41 = vld [vmem:[#allocation2 + $0x20] sm:$0xf]  ;;  %v3365_v42 = vld [vmem:[#allocation2 + $0x24] sm:$0xf0]  ;;  %v3380_v57 = vld [vmem:[#allocation2 + $0xa4] sm:$0xf] }
  0xcb   : > { %v2695_v46 = vor.u32 %v3365_v42, %v2694_v41 }
  0xcc   : > { %852 = vmatpush.bf16.msrb.mxu3 %v2615_v7  ;;  %1120 = vmatpush.bf16.msra.mxu1 %v2795_v45 }
  0xcd   : > { %832 = vmatpush.bf16.msrb.mxu2 %v2559_v53 }
  0xce   : > { %1102 = vmatpush.bf16.msra.mxu0 %v2723_v59  ;;  %v2760_v59 = vld [vmem:[#allocation2 + $0xa8] sm:$0xf0] }
  0xd0   : > { %1081 = vmatpush.bf16.msra.mxu3 %v2799_v21  ;;  %1121 = vmatpush.bf16.msra.mxu1 %v2787_v0  ;;  %v2686_v0 = vld [vmem:[#allocation2 + $0x10] sm:$0xf] }
  0xd1   : > { %833 = vmatpush.bf16.msrb.mxu2 %v2551_v2  ;;  %v2711_v2 = vor.u32 %v3369_v62, %v2710_v61  ;;  %v2763_v62 = vor.u32 %v3380_v57, %v2760_v59  ;;  %v3376_v59 = vld [vmem:[#allocation2 + $0x84] sm:$0xf] }
  0xd2   : > { %1103 = vmatpush.bf16.msra.mxu0 %v2715_v15 }
  0xd4   : > { %1082 = vmatpush.bf16.msra.mxu3 %v2791_v36  ;;  %v3382_v36 = vld [vmem:[#allocation2 + $0xb4] sm:$0xf] }
  0xd5   : > { %1062 = vmatpush.bf16.msra.mxu2 %v2735_v16  ;;  %v2776_v16 = vld [vmem:[#allocation2 + $0xc8] sm:$0xf0]  ;;  %v2771_v40 = vor.u32 %v3382_v36, %v2768_v37  ;;  %v2678_v37 = vld [vmem:[#allocation2] sm:$0xf] }
  0xd6   : > { %v2779_v17 = vor.u32 %v3384_v13, %v2776_v16 }
  0xd8   : > { %1083 = vmatpush.bf16.msra.mxu3 %v2783_v54  ;;  %1122 = vmatpush.bf16.msra.mxu1 %v2779_v17  ;;  %v3362_v17 = vld [vmem:[#allocation2 + $0x14] sm:$0xf] }
  0xd9   : > { %1063 = vmatpush.bf16.msra.mxu2 %v2727_v35  ;;  %v2704_v35 = vld [vmem:[#allocation2 + $0x38] sm:$0xf0] }
  0xda   : > { %v2707_v38 = vor.u32 %v3366_v31, %v2704_v35  ;;  %v2752_v31 = vld [vmem:[#allocation2 + $0x98] sm:$0xf0] }
  0xdb   : > { %v2755_v41 = vor.u32 %v3378_v30, %v2752_v31 }
  0xdc   : > { %1084 = vmatpush.bf16.msra.mxu3 %v2775_v9  ;;  %1104 = vmatpush.bf16.msra.mxu0 %v2707_v38  ;;  %v2750_v9 = vld [vmem:[#allocation2 + $0x90] sm:$0xf] }
  0xdd   : > { %1064 = vmatpush.bf16.msra.mxu2 %v2719_v50  ;;  %v2696_v50 = vld [vmem:[#allocation2 + $0x28] sm:$0xf0]  ;;  %1123 = vmatpush.bf16.msra.mxu1 %v2771_v40  ;;  %v2751_v16 = vor.u32 %v3379_v10, %v2750_v9  ;;  %v2878_v10 = vld [vmem:[#allocation2 + $0x270] sm:$0xf] }
  0xe0   : > { %1085 = vmatpush.bf16.msra.mxu3 %v2767_v32 }
  0xe1   : > { %1065 = vmatpush.bf16.msra.mxu2 %v2711_v2  ;;  %v3363_v2 = vld [vmem:[#allocation2 + $0x14] sm:$0xf0]  ;;  %1124 = vmatpush.bf16.msra.mxu1 %v2763_v62 }
  0xe2   : > { %v2687_v5 = vor.u32 %v3363_v2, %v2686_v0  ;;  %v2744_v2 = vld [vmem:[#allocation2 + $0x88] sm:$0xf0] }
  0xe5   : > { %1066 = vmatpush.bf16.msra.mxu2 %v2703_v27  ;;  %1125 = vmatpush.bf16.msra.mxu1 %v2755_v41  ;;  %v2934_v41 = vld [vmem:[#allocation2 + $0x2e0] sm:$0xf] }
  0xe9   : > { %1067 = vmatpush.bf16.msra.mxu2 %v2695_v46  ;;  %v3377_v46 = vld [vmem:[#allocation2 + $0x84] sm:$0xf0] }
  0xed   : > { %1068 = vmatpush.bf16.msra.mxu2 %v2687_v5 }
 0x132   : > { %v3806_v1 = vpop.f32.mrf.mxu2  ;;  %v3808_v6 = vpop.f32.mrf.mxu3 }
 0x133   : > { %v505_v11 = vmax.f32 %v3806_v1, 0.0  ;;  %v506_v12 = vmax.f32 %v3808_v6, 0.0 }
 0x135   : > { %v3814_v19 = vrot.slane %v505_v11, 7  ;;  %v3818_v20 = vrot.slane %v506_v12, 7 }
 0x137   : > { %v546_v43 = vsel %vm521_vm2, 0.0, %v3814_v19  ;;  %v547_v48 = vsel %vm521_vm2, 0.0, %v3818_v20 }
 0x13a   : > { %v3820_v28 = vpop.f32.mrf.mxu2  ;;  %v3823_v34 = vpop.f32.mrf.mxu3 }
 0x13b   : > { %v507_v33 = vmax.f32 %v3820_v28, 0.0  ;;  %v508_v39 = vmax.f32 %v3823_v34, 0.0 }
 0x13d   : > { %v3830_v44 = vrot.slane %v507_v33, 7  ;;  %v3836_v49 = vrot.slane %v508_v39, 7 }
 0x13f   : > { %v3841_v53 = vsel %vm521_vm2, %v3814_v19, %v3830_v44  ;;  %v3846_v58 = vsel %vm521_vm2, %v3818_v20, %v3836_v49 }
 0x140   : > { %v3849_v63 = vpack.c.bf16 %v3841_v53, %v546_v43  ;;  %v3852_v7 = vpack.c.bf16 %v3846_v58, %v547_v48  ;;  %v2758_v43 = vld [vmem:[#allocation2 + $0xa0] sm:$0xf]  ;;  %v3364_v48 = vld [vmem:[#allocation2 + $0x24] sm:$0xf] }
 0x141   : > { %v2759_v55 = vor.u32 %v3381_v47, %v2758_v43  ;;  %v2699_v56 = vor.u32 %v3364_v48, %v2696_v50  ;;  %v2742_v43 = vld [vmem:[#allocation2 + $0x80] sm:$0xf]  ;;  %v3360_v48 = vld [vmem:[#allocation2 + $0x4] sm:$0xf]  ;;  %v2680_v50 = vld [vmem:[#allocation2 + $0x8] sm:$0xf0] }
 0x142   : > { %v3854_v8 = vpop.f32.mrf.mxu2  ;;  %v3856_v14 = vpop.f32.mrf.mxu3  ;;  %v623_v21 = vshrl.u32 %v3849_v63, 16  ;;  %v625_v22 = vshll.u32 %v3849_v63, 16  ;;  %v637_v24 = vshll.u32 %v3852_v7, 16  ;;  %v635_v36 = vshrl.u32 %v3852_v7, 16 }
 0x143   : > { %v509_v18 = vmax.f32 %v3854_v8, 0.0  ;;  %v510_v23 = vmax.f32 %v3856_v14, 0.0  ;;  %1086 = vmatpush.bf16.msra.mxu3 %v2759_v55  ;;  %1105 = vmatpush.bf16.msra.mxu0 %v2699_v56  ;;  %v2743_v47 = vor.u32 %v3377_v46, %v2742_v43 }
 0x144   : > { %v627_v4 = vrot.slane %v625_v22, 1  ;;  %v639_v15 = vrot.slane %v637_v24, 1  ;;  %v2691_v22 = vor.u32 %v3362_v17, %v2688_v25 }
 0x145   : > { %v528_v51 = vrot.slane %v509_v18, 7  ;;  %v530_v60 = vrot.slane %v510_v23, 7 }
 0x146   : > { %v628_v55 = vor.u32 %v627_v4, %v623_v21  ;;  %v640_v56 = vor.u32 %v639_v15, %v635_v36  ;;  %v2747_v21 = vor.u32 %v3376_v59, %v2744_v2  ;;  %v2942_v15 = vld [vmem:[#allocation2 + $0x2f0] sm:$0xf]  ;;  %v2870_v36 = vld [vmem:[#allocation2 + $0x260] sm:$0xf] }
 0x147   : > { %v529_v26 = vsel %vm521_vm2, %v3830_v44, %v528_v51  ;;  %v531_v32 = vsel %vm521_vm2, %v3836_v49, %v530_v60  ;;  %v3361_v44 = vld [vmem:[#allocation2 + $0x4] sm:$0xf0]  ;;  %1087 = vmatpush.bf16.msra.mxu3 %v2751_v16  ;;  %1106 = vmatpush.bf16.msra.mxu0 %v2691_v22  ;;  %v2880_v22 = vld [vmem:[#allocation2 + $0x278] sm:$0xf0]  ;;  %v2926_v2 = vld [vmem:[#allocation2 + $0x2d0] sm:$0xf] }
 0x148   : > { %v2679_v42 = vor.u32 %v3361_v44, %v2678_v37  ;;  %1126 = vmatpush.bf16.msra.mxu1 %v2747_v21  ;;  %v3437_v44 = vld [vmem:[#allocation2 + $0x264] sm:$0xf0]  ;;  %v3434_v21 = vld [vmem:[#allocation2 + $0x254] sm:$0xf] }
 0x149   : > { %v2871_v46 = vor.u32 %v3437_v44, %v2870_v36 }
 0x14a   : > { %v3863_v45 = vpop.f32.mrf.mxu2  ;;  %v3868_v54 = vpop.f32.mrf.mxu3  ;;  %1069 = vmatpush.bf16.msra.mxu2 %v2679_v42  ;;  %v3453_v42 = vld [vmem:[#allocation2 + $0x2e4] sm:$0xf0] }
 0x14b   : > { %v4245_v52 = vmax.f32 %v3863_v45, 0.0  ;;  %v512_v61 = vmax.f32 %v3868_v54, 0.0  ;;  %1088 = vmatpush.bf16.msra.mxu3 %v2743_v47  ;;  %v3436_v47 = vld [vmem:[#allocation2 + $0x264] sm:$0xf]  ;;  %v4249_v8 = vmax.f32 %v3863_v45, 0.0 }
 0x14d   : > { %v532_v3 = vrot.slane %v4245_v52, 7  ;;  %v534_v13 = vrot.slane %v512_v61, 7 }
 0x14f   : > { %v533_v27 = vsel %vm521_vm2, %v528_v51, %v532_v3  ;;  %v548_v29 = vsel %vm521_vm2, %v532_v3, 0.0  ;;  %v535_v24 = vsel %vm521_vm2, %v530_v60, %v534_v13  ;;  %v1178_v51 = vrot.slane %v3849_v63, 1 }
 0x150   : > { %v3883_v35 = vpack.c.bf16 %v533_v27, %v529_v26  ;;  %v3887_v38 = vpack.c.bf16 %v548_v29, %v548_v29  ;;  %v3889_v40 = vpack.c.bf16 %v535_v24, %v531_v32  ;;  %v1181_v60 = vrot.slane %v3852_v7, 1  ;;  %v3455_v27 = vld [vmem:[#allocation2 + $0x2f4] sm:$0xf0]  ;;  %v3438_v29 = vld [vmem:[#allocation2 + $0x274] sm:$0xf] }
 0x151   : > { %v549_v62 = vsel %vm521_vm2, %v534_v13, 0.0  ;;  %v2683_v63 = vor.u32 %v3360_v48, %v2680_v50  ;;  %v3439_v13 = vld [vmem:[#allocation2 + $0x274] sm:$0xf0]  ;;  %v2943_v30 = vor.u32 %v3455_v27, %v2942_v15  ;;  %v2883_v31 = vor.u32 %v3438_v29, %v2880_v22  ;;  %v3454_v32 = vld [vmem:[#allocation2 + $0x2f4] sm:$0xf] }
 0x152   : > { %v630_v49 = vshll.u32 %v3883_v35, 16  ;;  %v642_v57 = vshll.u32 %v3889_v40, 16  ;;  %v1179_v3 = vrot.slane %v3883_v35, 1  ;;  %v1182_v5 = vrot.slane %v3889_v40, 1  ;;  %v2944_v24 = vld [vmem:[#allocation2 + $0x2f8] sm:$0xf0] }
 0x153   : > { %v1184_v4 = vrot.slane %v3887_v38, 1  ;;  %v2879_v26 = vor.u32 %v3439_v13, %v2878_v10  ;;  %1107 = vmatpush.bf16.msra.mxu0 %v2683_v63  ;;  %v2947_v37 = vor.u32 %v3454_v32, %v2944_v24  ;;  %v2872_v48 = vld [vmem:[#allocation2 + $0x268] sm:$0xf0]  ;;  %v3452_v50 = vld [vmem:[#allocation2 + $0x2e4] sm:$0xf]  ;;  %v587_v59 = vpack.c.bf16 %v549_v62, %v549_v62 }
 0x154   : > { %v3898_v0 = vrot.slane %v630_v49, 1  ;;  %v3902_v9 = vrot.slane %v642_v57, 1  ;;  %v3908_v16 = vsel %vm1177_vm4, %v1178_v51, %v1179_v3  ;;  %v3913_v17 = vsel %vm1177_vm4, %v1181_v60, %v1182_v5  ;;  %v3435_v57 = vld [vmem:[#allocation2 + $0x254] sm:$0xf0]  ;;  %v3433_v29 = vld [vmem:[#allocation2 + $0x244] sm:$0xf0] }
 0x155   : > { %v3918_v43 = vsel %vm1177_vm4, %v1179_v3, %v1184_v4  ;;  %v2935_v49 = vor.u32 %v3453_v42, %v2934_v41  ;;  %v2875_v51 = vor.u32 %v3436_v47, %v2872_v48  ;;  %v3451_v63 = vld [vmem:[#allocation2 + $0x2d4] sm:$0xf0]  ;;  %v2864_v3 = vld [vmem:[#allocation2 + $0x258] sm:$0xf0]  ;;  %v3450_v4 = vld [vmem:[#allocation2 + $0x2d4] sm:$0xf] }
 0x156   : > { %v633_v7 = vsel %vm621_vm3, %v628_v55, %v3898_v0  ;;  %v645_v25 = vsel %vm621_vm3, %v640_v56, %v3902_v9  ;;  %v2936_v55 = vld [vmem:[#allocation2 + $0x2e8] sm:$0xf0]  ;;  %v2862_v56 = vld [vmem:[#allocation2 + $0x250] sm:$0xf]  ;;  %v646_v10 = vshrl.u32 %v3883_v35, 16  ;;  %v2927_v15 = vor.u32 %v3451_v63, %v2926_v2 }
 0x157   : > { %834 = vmatmul.bf16.vlgmr.msrb.gmra.mxu2 %v633_v7  ;;  %872 = vmatmul.bf16.vlgmr.msrb.gmra.mxu0 %v633_v7  ;;  %v2939_v60 = vor.u32 %v3452_v50, %v2936_v55  ;;  %v2928_v7 = vld [vmem:[#allocation2 + $0x2d8] sm:$0xf0]  ;;  %v2863_v13 = vor.u32 %v3435_v57, %v2862_v56  ;;  %v2918_v62 = vld [vmem:[#allocation2 + $0x2c0] sm:$0xf]  ;;  %v3449_v22 = vld [vmem:[#allocation2 + $0x2c4] sm:$0xf0] }
 0x158   : > { %853 = vmatmul.bf16.vlgmr.msrb.gmra.mxu3 %v645_v25  ;;  %891 = vmatmul.bf16.vlgmr.msrb.gmra.mxu1 %v645_v25  ;;  %v2854_v25 = vld [vmem:[#allocation2 + $0x240] sm:$0xf]  ;;  %v2931_v27 = vor.u32 %v3450_v4, %v2928_v7  ;;  %v648_v32 = vor.u32 %v646_v10, %v3898_v0  ;;  %v654_v24 = vshrl.u32 %v3889_v40, 16  ;;  %v658_v36 = vshll.u32 %v587_v59, 16  ;;  %v2856_v42 = vld [vmem:[#allocation2 + $0x248] sm:$0xf0] }
 0x159   : > { %1352 = vmatpush.bf16.msrb.mxu2 %v2879_v26  ;;  %1371 = vmatpush.bf16.msrb.mxu3 %v2943_v30  ;;  %v2867_v26 = vor.u32 %v3434_v21, %v2864_v3  ;;  %v650_v30 = vshll.u32 %v3887_v38, 16  ;;  %v2855_v44 = vor.u32 %v3433_v29, %v2854_v25  ;;  %v2919_v41 = vor.u32 %v3449_v22, %v2918_v62  ;;  %v2846_v56 = vld [vmem:[#allocation2 + $0x230] sm:$0xf]  ;;  %v3431_v57 = vld [vmem:[#allocation2 + $0x234] sm:$0xf0] }
 0x15a   : > { %1390 = vmatpush.bf16.msrb.mxu0 %v2883_v31  ;;  %1409 = vmatpush.bf16.msrb.mxu1 %v2947_v37  ;;  %v1186_v31 = vrot.slane %v587_v59, 1  ;;  %v3432_v37 = vld [vmem:[#allocation2 + $0x244] sm:$0xf]  ;;  %v656_v38 = vor.u32 %v654_v24, %v3902_v9  ;;  %v660_v48 = vrot.slane %v658_v36, 1  ;;  %v2910_v59 = vld [vmem:[#allocation2 + $0x2b0] sm:$0xf] }
 0x15b   : > { %v652_v0 = vrot.slane %v650_v30, 1  ;;  %v2859_v50 = vor.u32 %v3432_v37, %v2856_v42  ;;  %v3447_v2 = vld [vmem:[#allocation2 + $0x2b4] sm:$0xf0]  ;;  %v3430_v9 = vld [vmem:[#allocation2 + $0x234] sm:$0xf] }
 0x15c   : > { %v3927_v47 = vsel %vm1177_vm4, %v1182_v5, %v1186_v31  ;;  %v2847_v5 = vor.u32 %v3431_v57, %v2846_v56  ;;  %v2848_v63 = vld [vmem:[#allocation2 + $0x238] sm:$0xf0]  ;;  %v2911_v21 = vor.u32 %v3447_v2, %v2910_v59  ;;  %v3446_v3 = vld [vmem:[#allocation2 + $0x2b4] sm:$0xf]  ;;  %v2838_v7 = vld [vmem:[#allocation2 + $0x220] sm:$0xf] }
 0x15d   : > { %1353 = vmatpush.bf16.msrb.mxu2 %v2871_v46  ;;  %1372 = vmatpush.bf16.msrb.mxu3 %v2935_v49  ;;  %v3448_v46 = vld [vmem:[#allocation2 + $0x2c4] sm:$0xf]  ;;  %v2920_v49 = vld [vmem:[#allocation2 + $0x2c8] sm:$0xf0]  ;;  %v653_v55 = vsel %vm621_vm3, %v648_v32, %v652_v0  ;;  %v2912_v4 = vld [vmem:[#allocation2 + $0x2b8] sm:$0xf0]  ;;  %v2851_v10 = vor.u32 %v3430_v9, %v2848_v63 }
 0x15e   : > { %1391 = vmatpush.bf16.msrb.mxu0 %v2875_v51  ;;  %1410 = vmatpush.bf16.msrb.mxu1 %v2939_v60  ;;  %v2923_v51 = vor.u32 %v3448_v46, %v2920_v49  ;;  %v661_v60 = vsel %vm621_vm3, %v656_v38, %v660_v48  ;;  %v2902_v25 = vld [vmem:[#allocation2 + $0x2a0] sm:$0xf]  ;;  %v3428_v62 = vld [vmem:[#allocation2 + $0x224] sm:$0xf]  ;;  %v2840_v22 = vld [vmem:[#allocation2 + $0x228] sm:$0xf0] }
 0x15f   : > { %v3444_v30 = vld [vmem:[#allocation2 + $0x2a4] sm:$0xf]  ;;  %v2904_v31 = vld [vmem:[#allocation2 + $0x2a8] sm:$0xf0]  ;;  %v2830_v32 = vld [vmem:[#allocation2 + $0x210] sm:$0xf] }
 0x160   : > { %v3427_v24 = vld [vmem:[#allocation2 + $0x214] sm:$0xf0]  ;;  %v2894_v36 = vld [vmem:[#allocation2 + $0x290] sm:$0xf]  ;;  %v3426_v42 = vld [vmem:[#allocation2 + $0x214] sm:$0xf] }
 0x161   : > { %1354 = vmatpush.bf16.msrb.mxu2 %v2863_v13  ;;  %1373 = vmatpush.bf16.msrb.mxu3 %v2927_v15  ;;  %v2915_v13 = vor.u32 %v3446_v3, %v2912_v4  ;;  %v3429_v15 = vld [vmem:[#allocation2 + $0x224] sm:$0xf0]  ;;  %v3443_v37 = vld [vmem:[#allocation2 + $0x294] sm:$0xf0]  ;;  %v2832_v46 = vld [vmem:[#allocation2 + $0x218] sm:$0xf0]  ;;  %v2831_v49 = vor.u32 %v3427_v24, %v2830_v32  ;;  %v2806_v4 = vpack.c.bf16 %v3841_v53, %v3814_v19 }
 0x162   : > { %1392 = vmatpush.bf16.msrb.mxu0 %v2867_v26  ;;  %1411 = vmatpush.bf16.msrb.mxu1 %v2931_v27  ;;  %v3445_v26 = vld [vmem:[#allocation2 + $0x2a4] sm:$0xf0]  ;;  %v2839_v27 = vor.u32 %v3429_v15, %v2838_v7  ;;  %v2895_v38 = vor.u32 %v3443_v37, %v2894_v36  ;;  %v3442_v0 = vld [vmem:[#allocation2 + $0x294] sm:$0xf]  ;;  %v2896_v48 = vld [vmem:[#allocation2 + $0x298] sm:$0xf0]  ;;  %v2835_v57 = vor.u32 %v3426_v42, %v2832_v46 }
 0x163   : > { %v2903_v29 = vor.u32 %v3445_v26, %v2902_v25  ;;  %v3441_v56 = vld [vmem:[#allocation2 + $0x284] sm:$0xf0]  ;;  %v2899_v59 = vor.u32 %v3442_v0, %v2896_v48  ;;  %v2824_v9 = vld [vmem:[#allocation2 + $0x208] sm:$0xf0]  ;;  %v3440_v63 = vld [vmem:[#allocation2 + $0x284] sm:$0xf] }
 0x165   : > { %1355 = vmatpush.bf16.msrb.mxu2 %v2855_v44  ;;  %1374 = vmatpush.bf16.msrb.mxu3 %v2919_v41  ;;  %v2843_v44 = vor.u32 %v3428_v62, %v2840_v22  ;;  %v2907_v41 = vor.u32 %v3444_v30, %v2904_v31 }
 0x166   : > { %1393 = vmatpush.bf16.msrb.mxu0 %v2859_v50  ;;  %1412 = vmatpush.bf16.msrb.mxu1 %v2923_v51  ;;  %v2822_v50 = vld [vmem:[#allocation2 + $0x200] sm:$0xf]  ;;  %v3425_v51 = vld [vmem:[#allocation2 + $0x204] sm:$0xf0] }
 0x167   : > { %839 = vmatmul.bf16.gmra.mxu2 %v653_v55  ;;  %877 = vmatmul.bf16.gmra.mxu0 %v653_v55  ;;  %v2886_v55 = vld [vmem:[#allocation2 + $0x280] sm:$0xf] }
 0x168   : > { %858 = vmatmul.bf16.gmra.mxu3 %v661_v60  ;;  %896 = vmatmul.bf16.gmra.mxu1 %v661_v60  ;;  %v3424_v60 = vld [vmem:[#allocation2 + $0x204] sm:$0xf]  ;;  %v2887_v2 = vor.u32 %v3441_v56, %v2886_v55  ;;  %v3519_v55 = vld [vmem:[#allocation4 + $0x1f4] sm:$0xf0]  ;;  %v3518_v56 = vld [vmem:[#allocation4 + $0x1f4] sm:$0xf] }
 0x169   : > { %1356 = vmatpush.bf16.msrb.mxu2 %v2847_v5  ;;  %1375 = vmatpush.bf16.msrb.mxu3 %v2911_v21  ;;  %v2823_v5 = vor.u32 %v3425_v51, %v2822_v50  ;;  %v2888_v21 = vld [vmem:[#allocation2 + $0x288] sm:$0xf0]  ;;  %v2827_v7 = vor.u32 %v3424_v60, %v2824_v9  ;;  %v3070_v51 = vld [vmem:[#allocation4 + $0x1f0] sm:$0xf]  ;;  %v3072_v60 = vld [vmem:[#allocation4 + $0x1f8] sm:$0xf0] }
 0x16a   : > { %1394 = vmatpush.bf16.msrb.mxu0 %v2851_v10  ;;  %1413 = vmatpush.bf16.msrb.mxu1 %v2915_v13  ;;  %v2891_v10 = vor.u32 %v3440_v63, %v2888_v21  ;;  %v2810_v13 = vpack.c.bf16 %v3846_v58, %v3818_v20  ;;  %v3062_v21 = vld [vmem:[#allocation4 + $0x1e0] sm:$0xf] }
 0x16d   : > { %1357 = vmatpush.bf16.msrb.mxu2 %v2839_v27  ;;  %1376 = vmatpush.bf16.msrb.mxu3 %v2903_v29 }
 0x16e   : > { %1395 = vmatpush.bf16.msrb.mxu0 %v2843_v44  ;;  %1414 = vmatpush.bf16.msrb.mxu1 %v2907_v41 }
 0x171   : > { %1358 = vmatpush.bf16.msrb.mxu2 %v2831_v49  ;;  %1377 = vmatpush.bf16.msrb.mxu3 %v2895_v38 }
 0x172   : > { %1396 = vmatpush.bf16.msrb.mxu0 %v2835_v57  ;;  %1415 = vmatpush.bf16.msrb.mxu1 %v2899_v59  ;;  %v3071_v59 = vor.u32 %v3519_v55, %v3070_v51  ;;  %v3056_v51 = vld [vmem:[#allocation4 + $0x1d8] sm:$0xf0] }
 0x175   : > { %1359 = vmatpush.bf16.msrb.mxu2 %v2823_v5  ;;  %1378 = vmatpush.bf16.msrb.mxu3 %v2887_v2  ;;  %v3075_v2 = vor.u32 %v3518_v56, %v3072_v60  ;;  %v1436_v56 = vld [vmem:[%s4241_s5] sm:$0x3] }
 0x176   : > { %1397 = vmatpush.bf16.msrb.mxu0 %v2827_v7  ;;  %1416 = vmatpush.bf16.msrb.mxu1 %v2891_v10  ;;  %v3516_v7 = vld [vmem:[#allocation4 + $0x1e4] sm:$0xf] }
 0x177   : > { %2807 = vmatmul.msk.bf16.vlgmr.msra.gmra.mxu2 %vm3933_vm7, %v2806_v4  ;;  %2815 = vmatmul.msk.bf16.vlgmr.msra.gmra.mxu0 %vm3933_vm7, %v2806_v4  ;;  %v3517_v4 = vld [vmem:[#allocation4 + $0x1e4] sm:$0xf0] }
 0x178   : > { %2811 = vmatmul.msk.bf16.vlgmr.msra.gmra.mxu3 %vm3933_vm7, %v2810_v13  ;;  %2819 = vmatmul.msk.bf16.vlgmr.msra.gmra.mxu1 %vm3933_vm7, %v2810_v13  ;;  %v3063_v10 = vor.u32 %v3517_v4, %v3062_v21  ;;  %v3064_v13 = vld [vmem:[#allocation4 + $0x1e8] sm:$0xf0]  ;;  %v3501_v21 = vld [vmem:[#allocation4 + $0x164] sm:$0xf0] }
 0x179   : > { %1788 = vmatpush.bf16.msra.mxu3 %v3071_v59 }
 0x17a   : > { %1826 = vmatpush.bf16.msra.mxu1 %v3075_v2  ;;  %v2998_v2 = vld [vmem:[#allocation4 + $0x160] sm:$0xf] }
 0x17d   : > { %1789 = vmatpush.bf16.msra.mxu3 %v3063_v10  ;;  %v3000_v10 = vld [vmem:[#allocation4 + $0x168] sm:$0xf0] }
 0x187   : > { %1075 = vmatmul.bf16.gmra.mxu2 %v3883_v35  ;;  %1113 = vmatmul.bf16.gmra.mxu0 %v3883_v35 }
 0x188   : > { %1094 = vmatmul.bf16.gmra.mxu3 %v3889_v40  ;;  %1132 = vmatmul.bf16.gmra.mxu1 %v3889_v40 }
 0x197   : > { %1360 = vmatmul.bf16.vlgmr.msrb.gmra.mxu2 %v3908_v16  ;;  %1398 = vmatmul.bf16.vlgmr.msrb.gmra.mxu0 %v3908_v16 }
 0x198   : > { %1379 = vmatmul.bf16.vlgmr.msrb.gmra.mxu3 %v3913_v17  ;;  %1417 = vmatmul.bf16.vlgmr.msrb.gmra.mxu1 %v3913_v17 }
 0x1a7   : > { %1365 = vmatmul.bf16.gmra.mxu2 %v3918_v43  ;;  %1403 = vmatmul.bf16.gmra.mxu0 %v3918_v43 }
 0x1a8   : > { %1384 = vmatmul.bf16.gmra.mxu3 %v3927_v47  ;;  %1422 = vmatmul.bf16.gmra.mxu1 %v3927_v47 }
 0x1d4   : > { %v873_v19 = vpop.f32.mrf.mxu0 }
 0x1d5   : > { %v892_v20 = vpop.f32.mrf.mxu1 }
 0x1d6   : > { %v893_v53 = vadd.f32 %v892_v20, %v873_v19  ;;  %v3006_v19 = vld [vmem:[#allocation4 + $0x170] sm:$0xf]  ;;  %v3503_v20 = vld [vmem:[#allocation4 + $0x174] sm:$0xf0] }
 0x1da   : > { %v835_v58 = vpop.f32.mrf.mxu2 }
 0x1db   : > { %v854_v35 = vpop.f32.mrf.mxu3 }
 0x1dc   : > { %v3961_v40 = vadd.f32 %v854_v35, %v835_v58  ;;  %v875_v16 = vpop.f32.mrf.mxu0  ;;  %v3067_v58 = vor.u32 %v3516_v7, %v3064_v13  ;;  %v3007_v35 = vor.u32 %v3503_v20, %v3006_v19  ;;  %v3500_v7 = vld [vmem:[#allocation4 + $0x164] sm:$0xf]  ;;  %v4008_v20 = vperm.slane %v1436_v56, 1 }
 0x1dd   : > { %v894_v15 = vpop.f32.mrf.mxu1 }
 0x1de   : > { %v3963_v25 = vadd.f32 %v894_v15, %v875_v16  ;;  %v3502_v16 = vld [vmem:[#allocation4 + $0x174] sm:$0xf]  ;;  %v3008_v15 = vld [vmem:[#allocation4 + $0x178] sm:$0xf0]  ;;  %1827 = vmatpush.bf16.msra.mxu1 %v3067_v58  ;;  %1769 = vmatpush.bf16.msra.mxu2 %v3007_v35  ;;  %v3046_v58 = vld [vmem:[#allocation4 + $0x1c0] sm:$0xf] }
 0x1df   : > { %v3513_v35 = vld [vmem:[#allocation4 + $0x1c4] sm:$0xf0] }
 0x1e2   : > { %v837_v17 = vpop.f32.mrf.mxu2 }
 0x1e3   : > { %v856_v26 = vpop.f32.mrf.mxu3 }
 0x1e4   : > { %v3965_v27 = vadd.f32 %v856_v26, %v837_v17  ;;  %v878_v43 = vpop.f32.mrf.mxu0  ;;  %v3054_v17 = vld [vmem:[#allocation4 + $0x1d0] sm:$0xf] }
 0x1e5   : > { %v897_v29 = vpop.f32.mrf.mxu1 }
 0x1e6   : > { %v3967_v62 = vadd.f32 %v897_v29, %v878_v43  ;;  %v3011_v29 = vor.u32 %v3502_v16, %v3008_v15  ;;  %v3003_v16 = vor.u32 %v3500_v7, %v3000_v10 }
 0x1e8   : > { %1807 = vmatpush.bf16.msra.mxu0 %v3011_v29  ;;  %v3047_v29 = vor.u32 %v3513_v35, %v3046_v58  ;;  %v2982_v58 = vld [vmem:[#allocation4 + $0x140] sm:$0xf] }
 0x1ea   : > { %v840_v47 = vpop.f32.mrf.mxu2 }
 0x1eb   : > { %v859_v22 = vpop.f32.mrf.mxu3 }
 0x1ec   : > { %v3969_v30 = vadd.f32 %v859_v22, %v840_v47  ;;  %v3971_v31 = vpop.f32.mrf.mxu0  ;;  %v3515_v47 = vld [vmem:[#allocation4 + $0x1d4] sm:$0xf0]  ;;  %v3514_v22 = vld [vmem:[#allocation4 + $0x1d4] sm:$0xf]  ;;  %1808 = vmatpush.bf16.msra.mxu0 %v3003_v16  ;;  %v3040_v16 = vld [vmem:[#allocation4 + $0x1b8] sm:$0xf0] }
 0x1ed   : > { %v3973_v32 = vpop.f32.mrf.mxu1  ;;  %v3055_v59 = vor.u32 %v3515_v47, %v3054_v17  ;;  %v3059_v60 = vor.u32 %v3514_v22, %v3056_v51  ;;  %v3512_v17 = vld [vmem:[#allocation4 + $0x1c4] sm:$0xf]  ;;  %v3048_v22 = vld [vmem:[#allocation4 + $0x1c8] sm:$0xf0] }
 0x1ee   : > { %v3051_v51 = vor.u32 %v3512_v17, %v3048_v22 }
 0x1ef   : > { %1790 = vmatpush.bf16.msra.mxu3 %v3055_v59  ;;  %1828 = vmatpush.bf16.msra.mxu1 %v3059_v60  ;;  %v3038_v60 = vld [vmem:[#allocation4 + $0x1b0] sm:$0xf] }
 0x1f2   : > { %v3975_v24 = vpop.f32.mrf.mxu2 }
 0x1f3   : > { %v3977_v36 = vpop.f32.mrf.mxu3  ;;  %1791 = vmatpush.bf16.msra.mxu3 %v3047_v29  ;;  %1829 = vmatpush.bf16.msra.mxu1 %v3051_v51  ;;  %v3497_v29 = vld [vmem:[#allocation4 + $0x144] sm:$0xf0] }
 0x1f4   : > { %v1109_v37 = vpop.f32.mrf.mxu0 }
 0x1f5   : > { %v1128_v44 = vpop.f32.mrf.mxu1  ;;  %v1110_v26 = vadd.f32 %v1109_v37, %v893_v53  ;;  %v2999_v37 = vor.u32 %v3501_v21, %v2998_v2  ;;  %v2990_v2 = vld [vmem:[#allocation4 + $0x150] sm:$0xf]  ;;  %v3499_v21 = vld [vmem:[#allocation4 + $0x154] sm:$0xf0] }
 0x1f7   : > { %v1129_v13 = vadd.f32 %v1128_v44, %v1110_v26  ;;  %1770 = vmatpush.bf16.msra.mxu2 %v2999_v37  ;;  %v3498_v44 = vld [vmem:[#allocation4 + $0x154] sm:$0xf]  ;;  %v3511_v37 = vld [vmem:[#allocation4 + $0x1b4] sm:$0xf0] }
 0x1fa   : > { %v1071_v41 = vpop.f32.mrf.mxu2 }
 0x1fb   : > { %v3979_v42 = vpop.f32.mrf.mxu3  ;;  %v1072_v15 = vadd.f32 %v1071_v41, %v3961_v40  ;;  %v2991_v40 = vor.u32 %v3499_v21, %v2990_v2  ;;  %v2992_v41 = vld [vmem:[#allocation4 + $0x158] sm:$0xf0]  ;;  %v2983_v2 = vor.u32 %v3497_v29, %v2982_v58  ;;  %v3496_v21 = vld [vmem:[#allocation4 + $0x144] sm:$0xf]  ;;  %v3507_v29 = vld [vmem:[#allocation4 + $0x194] sm:$0xf0] }
 0x1fc   : > { %v3981_v46 = vpop.f32.mrf.mxu0  ;;  %v2995_v10 = vor.u32 %v3498_v44, %v2992_v41 }
 0x1fd   : > { %v3983_v49 = vpop.f32.mrf.mxu1  ;;  %v1112_v26 = vadd.f32 %v3981_v46, %v3963_v25  ;;  %v4015_v25 = vperm.slane %v1436_v56, 0  ;;  %1771 = vmatpush.bf16.msra.mxu2 %v2991_v40  ;;  %v3030_v56 = vld [vmem:[#allocation4 + $0x1a0] sm:$0xf]  ;;  %v3508_v40 = vld [vmem:[#allocation4 + $0x1a4] sm:$0xf] }
 0x1fe   : > { %1809 = vmatpush.bf16.msra.mxu0 %v2995_v10 }
 0x201   : > { %1772 = vmatpush.bf16.msra.mxu2 %v2983_v2 }
 0x202   : > { %v3985_v38 = vpop.f32.mrf.mxu2 }
 0x203   : > { %v3987_v0 = vpop.f32.mrf.mxu3 }
 0x204   : > { %v3989_v48 = vpop.f32.mrf.mxu0 }
 0x205   : > { %v3991_v50 = vpop.f32.mrf.mxu1 }
 0x20a   : > { %v3993_v57 = vpop.f32.mrf.mxu2 }
 0x20b   : > { %v3995_v5 = vpop.f32.mrf.mxu3 }
 0x20c   : > { %v3997_v9 = vpop.f32.mrf.mxu0 }
 0x20d   : > { %v3999_v63 = vpop.f32.mrf.mxu1 }
 0x212   : > { %v4001_v43 = vpop.f32.mrf.mxu2 }
 0x213   : > { %v4003_v55 = vpop.f32.mrf.mxu3 }
 0x214   : > { %v1399_v53 = vpop.f32.mrf.mxu0 }
 0x215   : > { %v1418_v4 = vpop.f32.mrf.mxu1 }
 0x216   : > { %v1419_v19 = vadd.f32 %v1418_v4, %v1399_v53  ;;  %v1091_v4 = vadd.f32 %v3979_v42, %v1072_v15  ;;  %v2984_v42 = vld [vmem:[#allocation4 + $0x148] sm:$0xf0]  ;;  %v1131_v15 = vadd.f32 %v3983_v49, %v1112_v26  ;;  %v2974_v49 = vld [vmem:[#allocation4 + $0x130] sm:$0xf]  ;;  %v1115_v26 = vadd.f32 %v3989_v48, %v3967_v62  ;;  %v3506_v62 = vld [vmem:[#allocation4 + $0x194] sm:$0xf] }
 0x217   : > { %v2987_v41 = vor.u32 %v3496_v21, %v2984_v42  ;;  %v3024_v48 = vld [vmem:[#allocation4 + $0x198] sm:$0xf0]  ;;  %v2966_v42 = vld [vmem:[#allocation4 + $0x120] sm:$0xf] }
 0x218   : > { %v1429_v47 = vadd.f32 %v1419_v19, %v1129_v13  ;;  %v3039_v13 = vor.u32 %v3511_v37, %v3038_v60  ;;  %v3510_v19 = vld [vmem:[#allocation4 + $0x1b4] sm:$0xf] }
 0x219   : > { %1810 = vmatpush.bf16.msra.mxu0 %v2987_v41 }
 0x21a   : > { %v1443_v59 = vadd.f32 %v4008_v20, %v1429_v47  ;;  %v1361_v53 = vpop.f32.mrf.mxu2  ;;  %v3043_v47 = vor.u32 %v3510_v19, %v3040_v16  ;;  %1792 = vmatpush.bf16.msra.mxu3 %v3039_v13  ;;  %v3032_v19 = vld [vmem:[#allocation4 + $0x1a8] sm:$0xf0]  ;;  %v3495_v13 = vld [vmem:[#allocation4 + $0x134] sm:$0xf0] }
 0x21b   : > { %v1380_v7 = vpop.f32.mrf.mxu3 }
 0x21c   : > { %v1451_v35 = vmax.f32 %v1443_v59, 0.0  ;;  %v1381_v17 = vadd.f32 %v1380_v7, %v1361_v53  ;;  %v1401_v46 = vpop.f32.mrf.mxu0  ;;  %v1074_v59 = vadd.f32 %v3985_v38, %v3965_v27  ;;  %1830 = vmatpush.bf16.msra.mxu1 %v3043_v47  ;;  %v3509_v53 = vld [vmem:[#allocation4 + $0x1a4] sm:$0xf0]  ;;  %v3494_v27 = vld [vmem:[#allocation4 + $0x134] sm:$0xf] }
 0x21d   : > { %v1420_v22 = vpop.f32.mrf.mxu1  ;;  %v3031_v10 = vor.u32 %v3509_v53, %v3030_v56  ;;  %v2976_v38 = vld [vmem:[#allocation4 + $0x138] sm:$0xf0]  ;;  %v3022_v47 = vld [vmem:[#allocation4 + $0x190] sm:$0xf]  ;;  %v3027_v56 = vor.u32 %v3506_v62, %v3024_v48  ;;  %v3493_v53 = vld [vmem:[#allocation4 + $0x124] sm:$0xf0] }
 0x21e   : > { %v1428_v51 = vadd.f32 %v1381_v17, %v1091_v4  ;;  %v1421_v44 = vadd.f32 %v1420_v22, %v1401_v46  ;;  %v4020_v60 = vrot.slane %v1451_v35, 7  ;;  %v3035_v4 = vor.u32 %v3508_v40, %v3032_v19  ;;  %v3492_v40 = vld [vmem:[#allocation4 + $0x124] sm:$0xf]  ;;  %v2968_v19 = vld [vmem:[#allocation4 + $0x128] sm:$0xf0] }
 0x21f   : > { %1793 = vmatpush.bf16.msra.mxu3 %v3031_v10  ;;  %v2975_v17 = vor.u32 %v3495_v13, %v2974_v49  ;;  %v2979_v46 = vor.u32 %v3494_v27, %v2976_v38  ;;  %v1093_v22 = vadd.f32 %v3987_v0, %v1074_v59  ;;  %v3023_v21 = vor.u32 %v3507_v29, %v3022_v47  ;;  %v3014_v49 = vld [vmem:[#allocation4 + $0x180] sm:$0xf]  ;;  %v3487_v62 = vld [vmem:[#allocation4 + $0xf4] sm:$0xf0] }
 0x220   : > { %v1442_v37 = vadd.f32 %v4015_v25, %v1428_v51  ;;  %v1431_v7 = vadd.f32 %v1421_v44, %v1131_v15  ;;  %1831 = vmatpush.bf16.msra.mxu1 %v3035_v4  ;;  %v1491_v15 = vsel %vm521_vm2, 0.0, %v4020_v60  ;;  %v1134_v0 = vadd.f32 %v3991_v50, %v1115_v26  ;;  %v3505_v4 = vld [vmem:[#allocation4 + $0x184] sm:$0xf0]  ;;  %v2958_v26 = vld [vmem:[#allocation4 + $0x110] sm:$0xf] }
 0x221   : > { %1773 = vmatpush.bf16.msra.mxu2 %v2975_v17  ;;  %v1077_v59 = vadd.f32 %v3993_v57, %v3969_v30  ;;  %1811 = vmatpush.bf16.msra.mxu0 %v2979_v46  ;;  %v2967_v10 = vor.u32 %v3493_v53, %v2966_v42  ;;  %v2971_v50 = vor.u32 %v3492_v40, %v2968_v19  ;;  %v3491_v17 = vld [vmem:[#allocation4 + $0x114] sm:$0xf0]  ;;  %v3490_v46 = vld [vmem:[#allocation4 + $0x114] sm:$0xf] }
 0x222   : > { %v1450_v16 = vmax.f32 %v1442_v37, 0.0  ;;  %v1445_v58 = vadd.f32 %v4008_v20, %v1431_v7  ;;  %v1363_v35 = vpop.f32.mrf.mxu2  ;;  %v900_v37 = vadd.f32 %v3973_v32, %v3971_v31  ;;  %v3016_v31 = vld [vmem:[#allocation4 + $0x188] sm:$0xf0]  ;;  %v3015_v30 = vor.u32 %v3505_v4, %v3014_v49 }
 0x223   : > { %v1382_v2 = vpop.f32.mrf.mxu3  ;;  %1794 = vmatpush.bf16.msra.mxu3 %v3023_v21  ;;  %v3198_v21 = vld [vmem:[#allocation4 + $0xf0] sm:$0xf]  ;;  %v2952_v4 = vld [vmem:[#allocation4 + $0x108] sm:$0xf0] }
 0x224   : > { %v1453_v51 = vmax.f32 %v1445_v58, 0.0  ;;  %v1383_v44 = vadd.f32 %v1382_v2, %v1363_v35  ;;  %v1404_v41 = vpop.f32.mrf.mxu0  ;;  %v4034_v13 = vrot.slane %v1450_v16, 7  ;;  %v3504_v35 = vld [vmem:[#allocation4 + $0x184] sm:$0xf]  ;;  %v1117_v32 = vadd.f32 %v3997_v9, %v900_v37  ;;  %1832 = vmatpush.bf16.msra.mxu1 %v3027_v56  ;;  %v2960_v2 = vld [vmem:[#allocation4 + $0x118] sm:$0xf0] }
 0x225   : > { %v1423_v7 = vpop.f32.mrf.mxu1  ;;  %v3019_v57 = vor.u32 %v3504_v35, %v3016_v31  ;;  %1774 = vmatpush.bf16.msra.mxu2 %v2967_v10  ;;  %1812 = vmatpush.bf16.msra.mxu0 %v2971_v50  ;;  %v2963_v42 = vor.u32 %v3490_v46, %v2960_v2  ;;  %v2950_v56 = vld [vmem:[#allocation4 + $0x100] sm:$0xf]  ;;  %v3488_v10 = vld [vmem:[#allocation4 + $0x104] sm:$0xf]  ;;  %v3470_v2 = vld [vmem:[#allocation4 + $0x74] sm:$0xf] }
 0x226   : > { %v4036_v27 = vrot.slane %v1453_v51, 7  ;;  %v1430_v38 = vadd.f32 %v1383_v44, %v1093_v22  ;;  %v1424_v58 = vadd.f32 %v1423_v7, %v1404_v41  ;;  %v2959_v22 = vor.u32 %v3491_v17, %v2958_v26  ;;  %v3486_v44 = vld [vmem:[#allocation4 + $0xf4] sm:$0xf]  ;;  %v3200_v41 = vld [vmem:[#allocation4 + $0xf8] sm:$0xf0] }
 0x227   : > { %v3199_v51 = vor.u32 %v3487_v62, %v3198_v21  ;;  %1795 = vmatpush.bf16.msra.mxu3 %v3015_v30  ;;  %v3489_v7 = vld [vmem:[#allocation4 + $0x104] sm:$0xf0]  ;;  %v1136_v19 = vadd.f32 %v3999_v63, %v1117_v32  ;;  %v3484_v17 = vld [vmem:[#allocation4 + $0xe4] sm:$0xf]  ;;  %v2955_v63 = vor.u32 %v3488_v10, %v2952_v4  ;;  %v3192_v32 = vld [vmem:[#allocation4 + $0xe8] sm:$0xf0] }
 0x228   : > { %v1471_v16 = vsel %vm521_vm2, %v4020_v60, %v4036_v27  ;;  %v1444_v47 = vadd.f32 %v4015_v25, %v1430_v38  ;;  %v1433_v29 = vadd.f32 %v1424_v58, %v1134_v0  ;;  %v3203_v0 = vor.u32 %v3486_v44, %v3200_v41  ;;  %1833 = vmatpush.bf16.msra.mxu1 %v3019_v57  ;;  %v3190_v38 = vld [vmem:[#allocation4 + $0xe0] sm:$0xf]  ;;  %v3485_v26 = vld [vmem:[#allocation4 + $0xe4] sm:$0xf0]  ;;  %v3134_v57 = vld [vmem:[#allocation4 + $0x70] sm:$0xf] }
 0x229   : > { %v4043_v9 = vpack.c.bf16 %v1471_v16, %v1491_v15  ;;  %v4046_v48 = vpack.c.bf16 %v1471_v16, %v4020_v60  ;;  %v862_v15 = vadd.f32 %v3977_v36, %v3975_v24  ;;  %v1096_v60 = vadd.f32 %v3995_v5, %v1077_v59  ;;  %1775 = vmatpush.bf16.msra.mxu2 %v2959_v22  ;;  %v3471_v22 = vld [vmem:[#allocation4 + $0x74] sm:$0xf0]  ;;  %v3136_v44 = vld [vmem:[#allocation4 + $0x78] sm:$0xf0]  ;;  %v3182_v41 = vld [vmem:[#allocation4 + $0xd0] sm:$0xf] }
 0x22a   : > { %v1452_v53 = vmax.f32 %v1444_v47, 0.0  ;;  %v1447_v40 = vadd.f32 %v4008_v20, %v1433_v29  ;;  %v1366_v37 = vpop.f32.mrf.mxu2  ;;  %v2951_v30 = vor.u32 %v3489_v7, %v2950_v56  ;;  %v1490_v24 = vsel %vm521_vm2, 0.0, %v4034_v13  ;;  %1813 = vmatpush.bf16.msra.mxu0 %v2963_v42  ;;  %v3483_v56 = vld [vmem:[#allocation4 + $0xd4] sm:$0xf0]  ;;  %v3184_v7 = vld [vmem:[#allocation4 + $0xd8] sm:$0xf0] }
 0x22b   : > { %v1385_v49 = vpop.f32.mrf.mxu3  ;;  %2024 = vmatpush.bf16.msrb.mxu3 %v3199_v51  ;;  %v1580_v5 = vshll.u32 %v4043_v9, 16  ;;  %v3191_v59 = vor.u32 %v3485_v26, %v3190_v38  ;;  %v1079_v21 = vadd.f32 %v4001_v43, %v862_v15  ;;  %v3195_v51 = vor.u32 %v3484_v17, %v3192_v32  ;;  %v3482_v43 = vld [vmem:[#allocation4 + $0xd4] sm:$0xf]  ;;  %v3126_v10 = vld [vmem:[#allocation4 + $0x60] sm:$0xf] }
 0x22c   : > { %v4053_v58 = vrot.slane %v1452_v53, 7  ;;  %v1455_v35 = vmax.f32 %v1447_v40, 0.0  ;;  %v1386_v31 = vadd.f32 %v1385_v49, %v1366_v37  ;;  %v1406_v50 = vpop.f32.mrf.mxu0  ;;  %2062 = vmatpush.bf16.msrb.mxu1 %v3203_v0  ;;  %v3135_v0 = vor.u32 %v3471_v22, %v3134_v57  ;;  %v3468_v49 = vld [vmem:[#allocation4 + $0x64] sm:$0xf] }
 0x22d   : > { %v1425_v36 = vpop.f32.mrf.mxu1  ;;  %1776 = vmatpush.bf16.msra.mxu2 %v2951_v30  ;;  %v3183_v15 = vor.u32 %v3483_v56, %v3182_v41  ;;  %v1098_v30 = vadd.f32 %v4003_v55, %v1079_v21  ;;  %v1578_v17 = vshrl.u32 %v4043_v9, 16  ;;  %v3466_v55 = vld [vmem:[#allocation4 + $0x54] sm:$0xf]  ;;  %v3120_v21 = vld [vmem:[#allocation4 + $0x58] sm:$0xf0] }
 0x22e   : > { %v1469_v46 = vsel %vm521_vm2, %v4034_v13, %v4053_v58  ;;  %v4061_v16 = vrot.slane %v1455_v35, 7  ;;  %v1432_v47 = vadd.f32 %v1386_v31, %v1096_v60  ;;  %v1426_v29 = vadd.f32 %v1425_v36, %v1406_v50  ;;  %1814 = vmatpush.bf16.msra.mxu0 %v2955_v63  ;;  %v3469_v60 = vld [vmem:[#allocation4 + $0x64] sm:$0xf0]  ;;  %v3128_v50 = vld [vmem:[#allocation4 + $0x68] sm:$0xf0] }
 0x22f   : > { %v4064_v62 = vpack.c.bf16 %v1469_v46, %v1490_v24  ;;  %v4067_v42 = vpack.c.bf16 %v1469_v46, %v4034_v13  ;;  %2025 = vmatpush.bf16.msrb.mxu3 %v3191_v59  ;;  %v3139_v13 = vor.u32 %v3470_v2, %v3136_v44  ;;  %v3127_v31 = vor.u32 %v3469_v60, %v3126_v10  ;;  %v3481_v63 = vld [vmem:[#allocation4 + $0xc4] sm:$0xf0]  ;;  %v3480_v59 = vld [vmem:[#allocation4 + $0xc4] sm:$0xf]  ;;  %v3467_v2 = vld [vmem:[#allocation4 + $0x54] sm:$0xf0] }
 0x230   : > { %v1475_v53 = vsel %vm521_vm2, %v4036_v27, %v4061_v16  ;;  %v1446_v40 = vadd.f32 %v4015_v25, %v1432_v47  ;;  %v1435_v37 = vadd.f32 %v1426_v29, %v1136_v19  ;;  %2063 = vmatpush.bf16.msrb.mxu1 %v3195_v51  ;;  %v3187_v27 = vor.u32 %v3482_v43, %v3184_v7  ;;  %v3174_v19 = vld [vmem:[#allocation4 + $0xc0] sm:$0xf]  ;;  %v3176_v47 = vld [vmem:[#allocation4 + $0xc8] sm:$0xf0]  ;;  %v3118_v29 = vld [vmem:[#allocation4 + $0x50] sm:$0xf] }
 0x231   : > { %2005 = vmatpush.bf16.msrb.mxu2 %v3135_v0  ;;  %v1582_v24 = vrot.slane %v1580_v5, 1  ;;  %v3131_v36 = vor.u32 %v3468_v49, %v3128_v50  ;;  %v3175_v46 = vor.u32 %v3481_v63, %v3174_v19  ;;  %v3179_v22 = vor.u32 %v3480_v59, %v3176_v47  ;;  %v3166_v56 = vld [vmem:[#allocation4 + $0xb0] sm:$0xf]  ;;  %v3478_v43 = vld [vmem:[#allocation4 + $0xb4] sm:$0xf] }
 0x232   : > { %v1454_v4 = vmax.f32 %v1446_v40, 0.0  ;;  %v1449_v38 = vadd.f32 %v4008_v20, %v1435_v37  ;;  %v1368_v35 = vpop.f32.mrf.mxu2  ;;  %2043 = vmatpush.bf16.msrb.mxu0 %v3139_v13  ;;  %v3119_v41 = vor.u32 %v3467_v2, %v3118_v29  ;;  %v3479_v40 = vld [vmem:[#allocation4 + $0xb4] sm:$0xf0]  ;;  %v3123_v37 = vor.u32 %v3466_v55, %v3120_v21  ;;  %v3168_v7 = vld [vmem:[#allocation4 + $0xb8] sm:$0xf0] }
 0x233   : > { %v1387_v26 = vpop.f32.mrf.mxu3  ;;  %2026 = vmatpush.bf16.msrb.mxu3 %v3183_v15  ;;  %v3167_v0 = vor.u32 %v3479_v40, %v3166_v56  ;;  %v3110_v10 = vld [vmem:[#allocation4 + $0x40] sm:$0xf]  ;;  %v3465_v60 = vld [vmem:[#allocation4 + $0x44] sm:$0xf0]  ;;  %v3464_v49 = vld [vmem:[#allocation4 + $0x44] sm:$0xf] }
 0x234   : > { %v4076_v32 = vrot.slane %v1454_v4, 7  ;;  %v1457_v20 = vmax.f32 %v1449_v38, 0.0  ;;  %v1388_v57 = vadd.f32 %v1387_v26, %v1368_v35  ;;  %2064 = vmatpush.bf16.msrb.mxu1 %v3187_v27  ;;  %v2123_v4 = vrot.slane %v4043_v9, 1  ;;  %v3112_v27 = vld [vmem:[#allocation4 + $0x48] sm:$0xf0] }
 0x235   : > { %2006 = vmatpush.bf16.msrb.mxu2 %v3127_v31  ;;  %v3171_v35 = vor.u32 %v3478_v43, %v3168_v7  ;;  %v3158_v31 = vld [vmem:[#allocation4 + $0xa0] sm:$0xf]  ;;  %v3477_v50 = vld [vmem:[#allocation4 + $0xa4] sm:$0xf0]  ;;  %v3476_v26 = vld [vmem:[#allocation4 + $0xa4] sm:$0xf]  ;;  %v3115_v9 = vor.u32 %v3464_v49, %v3112_v27 }
 0x236   : > { %v1473_v5 = vsel %vm521_vm2, %v4053_v58, %v4076_v32  ;;  %v1478_v51 = vrot.slane %v1457_v20, 7  ;;  %v1434_v44 = vadd.f32 %v1388_v57, %v1098_v30  ;;  %2044 = vmatpush.bf16.msrb.mxu0 %v3131_v36  ;;  %v1568_v58 = vshll.u32 %v4064_v62, 16  ;;  %v3102_v59 = vld [vmem:[#allocation4 + $0x30] sm:$0xf]  ;;  %v3462_v47 = vld [vmem:[#allocation4 + $0x34] sm:$0xf] }
 0x237   : > { %2027 = vmatpush.bf16.msrb.mxu3 %v3175_v46  ;;  %v1566_v63 = vshrl.u32 %v4064_v62, 16  ;;  %v1583_v57 = vor.u32 %v1582_v24, %v1578_v17  ;;  %v3463_v46 = vld [vmem:[#allocation4 + $0x34] sm:$0xf0]  ;;  %v3474_v40 = vld [vmem:[#allocation4 + $0x94] sm:$0xf] }
 0x238   : > { %v1479_v13 = vsel %vm521_vm2, %v4061_v16, %v1478_v51  ;;  %v1448_v15 = vadd.f32 %v4015_v25, %v1434_v44  ;;  %2065 = vmatpush.bf16.msrb.mxu1 %v3179_v22  ;;  %v1493_v19 = vsel %vm521_vm2, %v1478_v51, 0.0  ;;  %v3111_v16 = vor.u32 %v3465_v60, %v3110_v10  ;;  %v3160_v25 = vld [vmem:[#allocation4 + $0xa8] sm:$0xf0]  ;;  %v3104_v51 = vld [vmem:[#allocation4 + $0x38] sm:$0xf0] }
 0x239   : > { %v4086_v38 = vpack.c.bf16 %v1479_v13, %v1475_v53  ;;  %2007 = vmatpush.bf16.msrb.mxu2 %v3119_v41  ;;  %v3159_v53 = vor.u32 %v3477_v50, %v3158_v31  ;;  %v1570_v2 = vrot.slane %v1568_v58, 1  ;;  %v4094_v55 = vpack.c.bf16 %v1493_v19, %v1493_v19  ;;  %v3150_v44 = vld [vmem:[#allocation4 + $0x90] sm:$0xf]  ;;  %v3475_v24 = vld [vmem:[#allocation4 + $0x94] sm:$0xf0] }
 0x23a   : > { %v1456_v30 = vmax.f32 %v1448_v15, 0.0  ;;  %2045 = vmatpush.bf16.msrb.mxu0 %v3123_v37  ;;  %v3163_v21 = vor.u32 %v3476_v26, %v3160_v25  ;;  %v3103_v17 = vor.u32 %v3463_v46, %v3102_v59  ;;  %v3107_v7 = vor.u32 %v3462_v47, %v3104_v51  ;;  %v3152_v10 = vld [vmem:[#allocation4 + $0x98] sm:$0xf0]  ;;  %v3094_v13 = vld [vmem:[#allocation4 + $0x20] sm:$0xf] }
 0x23b   : > { %v1585_v36 = vshll.u32 %v4086_v38, 16  ;;  %2028 = vmatpush.bf16.msrb.mxu3 %v3167_v0  ;;  %v2124_v29 = vrot.slane %v4086_v38, 1  ;;  %v3151_v58 = vor.u32 %v3475_v24, %v3150_v44  ;;  %v3460_v60 = vld [vmem:[#allocation4 + $0x24] sm:$0xf]  ;;  %v3096_v49 = vld [vmem:[#allocation4 + $0x28] sm:$0xf0]  ;;  %v1571_v50 = vor.u32 %v1570_v2, %v1566_v63 }
 0x23c   : > { %v1476_v20 = vrot.slane %v1456_v30, 7  ;;  %2066 = vmatpush.bf16.msrb.mxu1 %v3171_v35  ;;  %v3155_v35 = vor.u32 %v3474_v40, %v3152_v10  ;;  %v3473_v27 = vld [vmem:[#allocation4 + $0x84] sm:$0xf0]  ;;  %v3472_v31 = vld [vmem:[#allocation4 + $0x84] sm:$0xf] }
 0x23d   : > { %v4092_v22 = vrot.slane %v1585_v36, 1  ;;  %2008 = vmatpush.bf16.msrb.mxu2 %v3111_v16  ;;  %v4100_v37 = vsel %vm1177_vm4, %v2123_v4, %v2124_v29  ;;  %v3142_v4 = vld [vmem:[#allocation4 + $0x80] sm:$0xf]  ;;  %v3144_v19 = vld [vmem:[#allocation4 + $0x88] sm:$0xf0]  ;;  %v2120_v16 = vrot.slane %v4064_v62, 1 }
 0x23e   : > { %v1477_v41 = vsel %vm521_vm2, %v4076_v32, %v1476_v20  ;;  %v1492_v56 = vsel %vm521_vm2, %v1476_v20, 0.0  ;;  %2046 = vmatpush.bf16.msrb.mxu0 %v3115_v9  ;;  %v3461_v32 = vld [vmem:[#allocation4 + $0x24] sm:$0xf0]  ;;  %v3086_v30 = vld [vmem:[#allocation4 + $0x10] sm:$0xf]  ;;  %v3099_v9 = vor.u32 %v3460_v60, %v3096_v49  ;;  %v2128_v20 = vrot.slane %v4094_v55, 1 }
 0x23f   : > { %v4102_v0 = vpack.c.bf16 %v1477_v41, %v1473_v5  ;;  %v1588_v43 = vsel %vm621_vm3, %v1583_v57, %v4092_v22  ;;  %2029 = vmatpush.bf16.msrb.mxu3 %v3159_v53  ;;  %v4106_v15 = vpack.c.bf16 %v1492_v56, %v1492_v56  ;;  %v3095_v36 = vor.u32 %v3461_v32, %v3094_v13  ;;  %v3459_v53 = vld [vmem:[#allocation4 + $0x14] sm:$0xf0]  ;;  %v3458_v59 = vld [vmem:[#allocation4 + $0x14] sm:$0xf]  ;;  %v3088_v46 = vld [vmem:[#allocation4 + $0x18] sm:$0xf0] }
 0x240   : > { %1796 = vmatmul.bf16.vlgmr.msra.gmra.mxu3 %v1588_v43  ;;  %1834 = vmatmul.bf16.vlgmr.msra.gmra.mxu1 %v1588_v43  ;;  %v3143_v57 = vor.u32 %v3473_v27, %v3142_v4  ;;  %v3342_v63 = vld [vmem:[#allocation4 + $0x2f0] sm:$0xf]  ;;  %v3551_v51 = vld [vmem:[#allocation4 + $0x2f4] sm:$0xf0]  ;;  %v3550_v44 = vld [vmem:[#allocation4 + $0x2f4] sm:$0xf]  ;;  %v4121_v56 = vsel %vm1177_vm4, %v2124_v29, %v2128_v20  ;;  %v3087_v10 = vor.u32 %v3459_v53, %v3086_v30 }
 0x241   : > { %v1573_v5 = vshll.u32 %v4102_v0, 16  ;;  %2067 = vmatpush.bf16.msrb.mxu1 %v3163_v21  ;;  %2009 = vmatpush.bf16.msrb.mxu2 %v3103_v17  ;;  %v2121_v26 = vrot.slane %v4102_v0, 1  ;;  %v2126_v62 = vrot.slane %v4106_v15, 1  ;;  %v3147_v21 = vor.u32 %v3472_v31, %v3144_v19  ;;  %v3344_v41 = vld [vmem:[#allocation4 + $0x2f8] sm:$0xf0] }
 0x242   : > { %2047 = vmatpush.bf16.msrb.mxu0 %v3107_v7  ;;  %v3343_v17 = vor.u32 %v3551_v51, %v3342_v63  ;;  %v3347_v24 = vor.u32 %v3550_v44, %v3344_v41  ;;  %v3078_v40 = vld [vmem:[#allocation4] sm:$0xf]  ;;  %v3457_v43 = vld [vmem:[#allocation4 + $0x4] sm:$0xf0]  ;;  %v3091_v13 = vor.u32 %v3458_v59, %v3088_v46  ;;  %v3456_v32 = vld [vmem:[#allocation4 + $0x4] sm:$0xf] }
 0x243   : > { %v4111_v25 = vrot.slane %v1573_v5, 1  ;;  %2030 = vmatpush.bf16.msrb.mxu3 %v3151_v58  ;;  %v4115_v47 = vsel %vm1177_vm4, %v2120_v16, %v2121_v26  ;;  %v4124_v7 = vsel %vm1177_vm4, %v2121_v26, %v2126_v62  ;;  %v3334_v58 = vld [vmem:[#allocation4 + $0x2e0] sm:$0xf]  ;;  %v3549_v60 = vld [vmem:[#allocation4 + $0x2e4] sm:$0xf0]  ;;  %v1597_v5 = vshrl.u32 %v4086_v38, 16 }
 0x244   : > { %v3080_v49 = vld [vmem:[#allocation4 + $0x8] sm:$0xf0]  ;;  %v3548_v29 = vld [vmem:[#allocation4 + $0x2e4] sm:$0xf]  ;;  %v3335_v27 = vor.u32 %v3549_v60, %v3334_v58  ;;  %v3278_v31 = vld [vmem:[#allocation4 + $0x270] sm:$0xf] }
 0x245   : > { %v1576_v2 = vsel %vm621_vm3, %v1571_v50, %v4111_v25  ;;  %2068 = vmatpush.bf16.msrb.mxu1 %v3155_v35  ;;  %2010 = vmatpush.bf16.msrb.mxu2 %v3095_v36  ;;  %v3336_v4 = vld [vmem:[#allocation4 + $0x2e8] sm:$0xf0]  ;;  %v1601_v35 = vshll.u32 %v4094_v55, 16  ;;  %v3535_v50 = vld [vmem:[#allocation4 + $0x274] sm:$0xf0]  ;;  %v1599_v36 = vor.u32 %v1597_v5, %v4092_v22  ;;  %v3083_v53 = vor.u32 %v3456_v32, %v3080_v49 }
 0x246   : > { %1777 = vmatmul.bf16.vlgmr.msra.gmra.mxu2 %v1576_v2  ;;  %1815 = vmatmul.bf16.vlgmr.msra.gmra.mxu0 %v1576_v2  ;;  %v3339_v19 = vor.u32 %v3548_v29, %v3336_v4  ;;  %v3534_v30 = vld [vmem:[#allocation4 + $0x274] sm:$0xf]  ;;  %v3280_v16 = vld [vmem:[#allocation4 + $0x278] sm:$0xf0]  ;;  %v3326_v26 = vld [vmem:[#allocation4 + $0x2d0] sm:$0xf]  ;;  %v3279_v46 = vor.u32 %v3535_v50, %v3278_v31 }
 0x247   : > { %2048 = vmatpush.bf16.msrb.mxu0 %v3099_v9  ;;  %2031 = vmatpush.bf16.msrb.mxu3 %v3143_v57  ;;  %v3079_v9 = vor.u32 %v3457_v43, %v3078_v40  ;;  %v3547_v59 = vld [vmem:[#allocation4 + $0x2d4] sm:$0xf0]  ;;  %v3546_v20 = vld [vmem:[#allocation4 + $0x2d4] sm:$0xf]  ;;  %v3328_v57 = vld [vmem:[#allocation4 + $0x2d8] sm:$0xf0]  ;;  %v3283_v63 = vor.u32 %v3534_v30, %v3280_v16 }
 0x248   : > { %v1603_v55 = vrot.slane %v1601_v35, 1  ;;  %v3270_v62 = vld [vmem:[#allocation4 + $0x260] sm:$0xf]  ;;  %v3327_v2 = vor.u32 %v3547_v59, %v3326_v26  ;;  %v3533_v51 = vld [vmem:[#allocation4 + $0x264] sm:$0xf0] }
 0x249   : > { %2069 = vmatpush.bf16.msrb.mxu1 %v3147_v21  ;;  %2011 = vmatpush.bf16.msrb.mxu2 %v3087_v10  ;;  %v3331_v21 = vor.u32 %v3546_v20, %v3328_v57  ;;  %v3532_v44 = vld [vmem:[#allocation4 + $0x264] sm:$0xf]  ;;  %v3272_v41 = vld [vmem:[#allocation4 + $0x268] sm:$0xf0]  ;;  %v3318_v40 = vld [vmem:[#allocation4 + $0x2c0] sm:$0xf]  ;;  %v3271_v58 = vor.u32 %v3533_v51, %v3270_v62 }
 0x24a   : > { %v1604_v22 = vsel %vm621_vm3, %v1599_v36, %v1603_v55  ;;  %v3545_v43 = vld [vmem:[#allocation4 + $0x2c4] sm:$0xf0]  ;;  %v3544_v10 = vld [vmem:[#allocation4 + $0x2c4] sm:$0xf]  ;;  %v3275_v60 = vor.u32 %v3532_v44, %v3272_v41  ;;  %v3262_v49 = vld [vmem:[#allocation4 + $0x250] sm:$0xf] }
 0x24b   : > { %2313 = vmatpush.bf16.msra.mxu3 %v3343_v17  ;;  %2049 = vmatpush.bf16.msrb.mxu0 %v3091_v13  ;;  %v1589_v17 = vshrl.u32 %v4102_v0, 16  ;;  %v3320_v13 = vld [vmem:[#allocation4 + $0x2c8] sm:$0xf0]  ;;  %v3531_v29 = vld [vmem:[#allocation4 + $0x254] sm:$0xf0]  ;;  %v3319_v35 = vor.u32 %v3545_v43, %v3318_v40 }
 0x24c   : > { %v3530_v4 = vld [vmem:[#allocation4 + $0x254] sm:$0xf]  ;;  %v3310_v31 = vld [vmem:[#allocation4 + $0x2b0] sm:$0xf]  ;;  %v3543_v50 = vld [vmem:[#allocation4 + $0x2b4] sm:$0xf0] }
 0x24d   : > { %2351 = vmatpush.bf16.msra.mxu1 %v3347_v24  ;;  %v1593_v24 = vshll.u32 %v4106_v15, 16  ;;  %2012 = vmatpush.bf16.msrb.mxu2 %v3079_v9  ;;  %v1591_v32 = vor.u32 %v1589_v17, %v4111_v25  ;;  %v3264_v15 = vld [vmem:[#allocation4 + $0x258] sm:$0xf0]  ;;  %v3263_v25 = vor.u32 %v3531_v29, %v3262_v49  ;;  %v3254_v36 = vld [vmem:[#allocation4 + $0x240] sm:$0xf]  ;;  %v3311_v20 = vor.u32 %v3543_v50, %v3310_v31 }
 0x24e   : > { %v3312_v30 = vld [vmem:[#allocation4 + $0x2b8] sm:$0xf0]  ;;  %v3267_v26 = vor.u32 %v3530_v4, %v3264_v15  ;;  %v3529_v9 = vld [vmem:[#allocation4 + $0x244] sm:$0xf0]  ;;  %v3256_v59 = vld [vmem:[#allocation4 + $0x248] sm:$0xf0] }
 0x24f   : > { %2314 = vmatpush.bf16.msra.mxu3 %v3335_v27  ;;  %2050 = vmatpush.bf16.msrb.mxu0 %v3083_v53  ;;  %v1595_v5 = vrot.slane %v1593_v24, 1  ;;  %v3323_v27 = vor.u32 %v3544_v10, %v3320_v13  ;;  %v3528_v53 = vld [vmem:[#allocation4 + $0x244] sm:$0xf]  ;;  %v3302_v55 = vld [vmem:[#allocation4 + $0x2a0] sm:$0xf] }
 0x250   : > { %1801 = vmatmul.bf16.gmra.mxu3 %v1604_v22  ;;  %1839 = vmatmul.bf16.gmra.mxu1 %v1604_v22  ;;  %v3304_v62 = vld [vmem:[#allocation4 + $0x2a8] sm:$0xf0]  ;;  %v3246_v51 = vld [vmem:[#allocation4 + $0x230] sm:$0xf]  ;;  %v3527_v44 = vld [vmem:[#allocation4 + $0x234] sm:$0xf0] }
 0x251   : > { %2352 = vmatpush.bf16.msra.mxu1 %v3339_v19  ;;  %2294 = vmatpush.bf16.msra.mxu2 %v3279_v46  ;;  %v3542_v19 = vld [vmem:[#allocation4 + $0x2b4] sm:$0xf]  ;;  %v1596_v16 = vsel %vm621_vm3, %v1591_v32, %v1595_v5  ;;  %v3541_v46 = vld [vmem:[#allocation4 + $0x2a4] sm:$0xf0]  ;;  %v3248_v22 = vld [vmem:[#allocation4 + $0x238] sm:$0xf0]  ;;  %v3247_v32 = vor.u32 %v3527_v44, %v3246_v51 }
 0x252   : > { %v3315_v57 = vor.u32 %v3542_v19, %v3312_v30  ;;  %v3526_v41 = vld [vmem:[#allocation4 + $0x234] sm:$0xf]  ;;  %v3303_v17 = vor.u32 %v3541_v46, %v3302_v55  ;;  %v3294_v40 = vld [vmem:[#allocation4 + $0x290] sm:$0xf]  ;;  %v3539_v43 = vld [vmem:[#allocation4 + $0x294] sm:$0xf0] }
 0x253   : > { %2332 = vmatpush.bf16.msra.mxu0 %v3283_v63  ;;  %2315 = vmatpush.bf16.msra.mxu3 %v3327_v2  ;;  %v3540_v63 = vld [vmem:[#allocation4 + $0x2a4] sm:$0xf]  ;;  %v3255_v2 = vor.u32 %v3529_v9, %v3254_v36  ;;  %v3538_v10 = vld [vmem:[#allocation4 + $0x294] sm:$0xf]  ;;  %v3296_v13 = vld [vmem:[#allocation4 + $0x298] sm:$0xf0]  ;;  %v3295_v15 = vor.u32 %v3539_v43, %v3294_v40 }
 0x254   : > { %v3307_v24 = vor.u32 %v3540_v63, %v3304_v62  ;;  %v3525_v49 = vld [vmem:[#allocation4 + $0x224] sm:$0xf0]  ;;  %v3524_v29 = vld [vmem:[#allocation4 + $0x224] sm:$0xf]  ;;  %v3240_v4 = vld [vmem:[#allocation4 + $0x228] sm:$0xf0]  ;;  %v3299_v5 = vor.u32 %v3538_v10, %v3296_v13 }
 0x255   : > { %2353 = vmatpush.bf16.msra.mxu1 %v3331_v21  ;;  %2295 = vmatpush.bf16.msra.mxu2 %v3271_v58  ;;  %v3259_v21 = vor.u32 %v3528_v53, %v3256_v59  ;;  %v3251_v58 = vor.u32 %v3526_v41, %v3248_v22  ;;  %v3536_v31 = vld [vmem:[#allocation4 + $0x284] sm:$0xf]  ;;  %v3288_v50 = vld [vmem:[#allocation4 + $0x288] sm:$0xf0]  ;;  %v3243_v30 = vor.u32 %v3524_v29, %v3240_v4  ;;  %v3232_v36 = vld [vmem:[#allocation4 + $0x218] sm:$0xf0] }
 0x256   : > { %1782 = vmatmul.bf16.gmra.mxu2 %v1596_v16  ;;  %1820 = vmatmul.bf16.gmra.mxu0 %v1596_v16  ;;  %v3230_v16 = vld [vmem:[#allocation4 + $0x210] sm:$0xf]  ;;  %v3291_v53 = vor.u32 %v3536_v31, %v3288_v50  ;;  %v3520_v55 = vld [vmem:[#allocation4 + $0x204] sm:$0xf]  ;;  %v3224_v46 = vld [vmem:[#allocation4 + $0x208] sm:$0xf0] }
 0x257   : > { %2333 = vmatpush.bf16.msra.mxu0 %v3275_v60  ;;  %2316 = vmatpush.bf16.msra.mxu3 %v3319_v35  ;;  %v3238_v60 = vld [vmem:[#allocation4 + $0x220] sm:$0xf]  ;;  %v3227_v62 = vor.u32 %v3520_v55, %v3224_v46 }
 0x258   : > { %v3286_v35 = vld [vmem:[#allocation4 + $0x280] sm:$0xf]  ;;  %v3239_v19 = vor.u32 %v3525_v49, %v3238_v60 }
 0x259   : > { %2354 = vmatpush.bf16.msra.mxu1 %v3323_v27  ;;  %2296 = vmatpush.bf16.msra.mxu2 %v3263_v25  ;;  %v3537_v27 = vld [vmem:[#allocation4 + $0x284] sm:$0xf0]  ;;  %v3523_v25 = vld [vmem:[#allocation4 + $0x214] sm:$0xf0] }
 0x25a   : > { %v3287_v9 = vor.u32 %v3537_v27, %v3286_v35  ;;  %v3231_v59 = vor.u32 %v3523_v25, %v3230_v16  ;;  %v2378_v25 = vld [vmem:[%s4243_s7] sm:$0x3] }
 0x25b   : > { %2334 = vmatpush.bf16.msra.mxu0 %v3267_v26  ;;  %2317 = vmatpush.bf16.msra.mxu3 %v3311_v20  ;;  %v3522_v26 = vld [vmem:[#allocation4 + $0x214] sm:$0xf]  ;;  %v4187_v52 = vperm.slane %v2378_v25, 0 }
 0x25c   : > { %v3235_v20 = vor.u32 %v3522_v26, %v3232_v36 }
 0x25d   : > { %2355 = vmatpush.bf16.msra.mxu1 %v3315_v57  ;;  %2297 = vmatpush.bf16.msra.mxu2 %v3255_v2  ;;  %v3521_v57 = vld [vmem:[#allocation4 + $0x204] sm:$0xf0] }
 0x25f   : > { %2335 = vmatpush.bf16.msra.mxu0 %v3259_v21  ;;  %2318 = vmatpush.bf16.msra.mxu3 %v3303_v17 }
 0x260   : > { %3211 = vmatmul.msk.bf16.vlgmr.msrb.gmra.mxu3 %vm3933_vm7, %v4046_v48  ;;  %3219 = vmatmul.msk.bf16.vlgmr.msrb.gmra.mxu1 %vm3933_vm7, %v4046_v48  ;;  %v3222_v48 = vld [vmem:[#allocation4 + $0x200] sm:$0xf] }
 0x261   : > { %2356 = vmatpush.bf16.msra.mxu1 %v3307_v24  ;;  %2298 = vmatpush.bf16.msra.mxu2 %v3247_v32  ;;  %v3223_v63 = vor.u32 %v3521_v57, %v3222_v48 }
 0x263   : > { %2336 = vmatpush.bf16.msra.mxu0 %v3251_v58  ;;  %2319 = vmatpush.bf16.msra.mxu3 %v3295_v15 }
 0x265   : > { %2357 = vmatpush.bf16.msra.mxu1 %v3299_v5  ;;  %2299 = vmatpush.bf16.msra.mxu2 %v3239_v19 }
 0x266   : > { %3207 = vmatmul.msk.bf16.vlgmr.msrb.gmra.mxu2 %vm3933_vm7, %v4067_v42  ;;  %3215 = vmatmul.msk.bf16.vlgmr.msrb.gmra.mxu0 %vm3933_vm7, %v4067_v42 }
 0x267   : > { %2337 = vmatpush.bf16.msra.mxu0 %v3243_v30  ;;  %2320 = vmatpush.bf16.msra.mxu3 %v3287_v9 }
 0x269   : > { %2358 = vmatpush.bf16.msra.mxu1 %v3291_v53  ;;  %2300 = vmatpush.bf16.msra.mxu2 %v3231_v59 }
 0x26b   : > { %2338 = vmatpush.bf16.msra.mxu0 %v3235_v20  ;;  %v4181_v20 = vperm.slane %v2378_v25, 1 }
 0x26d   : > { %2301 = vmatpush.bf16.msra.mxu2 %v3223_v63 }
 0x26f   : > { %2339 = vmatpush.bf16.msra.mxu0 %v3227_v62 }
 0x270   : > { %2037 = vmatmul.bf16.gmra.mxu3 %v4086_v38  ;;  %2075 = vmatmul.bf16.gmra.mxu1 %v4086_v38 }
 0x276   : > { %2018 = vmatmul.bf16.gmra.mxu2 %v4102_v0  ;;  %2056 = vmatmul.bf16.gmra.mxu0 %v4102_v0 }
 0x280   : > { %2321 = vmatmul.bf16.vlgmr.msra.gmra.mxu3 %v4100_v37  ;;  %2359 = vmatmul.bf16.vlgmr.msra.gmra.mxu1 %v4100_v37 }
 0x286   : > { %2302 = vmatmul.bf16.vlgmr.msra.gmra.mxu2 %v4115_v47  ;;  %2340 = vmatmul.bf16.vlgmr.msra.gmra.mxu0 %v4115_v47 }
 0x290   : > { %2326 = vmatmul.bf16.gmra.mxu3 %v4121_v56  ;;  %2364 = vmatmul.bf16.gmra.mxu1 %v4121_v56 }
 0x296   : > { %2307 = vmatmul.bf16.gmra.mxu2 %v4124_v7  ;;  %2345 = vmatmul.bf16.gmra.mxu0 %v4124_v7 }
 0x2bd   : > { %v1835_v3 = vpop.f32.mrf.mxu1 }
 0x2c3   : > { %v1797_v42 = vpop.f32.mrf.mxu3  ;;  %v1816_v38 = vpop.f32.mrf.mxu0 }
 0x2c4   : > { %v1836_v19 = vadd.f32 %v1835_v3, %v1816_v38 }
 0x2c5   : > { %v1837_v0 = vpop.f32.mrf.mxu1 }
 0x2c9   : > { %v1778_v2 = vpop.f32.mrf.mxu2 }
 0x2ca   : > { %v1798_v9 = vadd.f32 %v1797_v42, %v1778_v2 }
 0x2cb   : > { %v1799_v21 = vpop.f32.mrf.mxu3  ;;  %v1818_v51 = vpop.f32.mrf.mxu0 }
 0x2cc   : > { %v1838_v48 = vadd.f32 %v1837_v0, %v1818_v51 }
 0x2cd   : > { %v1840_v37 = vpop.f32.mrf.mxu1 }
 0x2d1   : > { %v1780_v44 = vpop.f32.mrf.mxu2 }
 0x2d2   : > { %v1800_v42 = vadd.f32 %v1799_v21, %v1780_v44 }
 0x2d3   : > { %v4158_v41 = vpop.f32.mrf.mxu3  ;;  %v1821_v47 = vpop.f32.mrf.mxu0 }
 0x2d5   : > { %v4160_v22 = vpop.f32.mrf.mxu1 }
 0x2d9   : > { %v4162_v17 = vpop.f32.mrf.mxu2 }
 0x2db   : > { %v4164_v56 = vpop.f32.mrf.mxu3  ;;  %v4166_v24 = vpop.f32.mrf.mxu0 }
 0x2dd   : > { %v2071_v7 = vpop.f32.mrf.mxu1 }
 0x2e1   : > { %v4168_v40 = vpop.f32.mrf.mxu2 }
 0x2e3   : > { %v2033_v43 = vpop.f32.mrf.mxu3  ;;  %v2052_v10 = vpop.f32.mrf.mxu0 }
 0x2e4   : > { %v2053_v30 = vadd.f32 %v2052_v10, %v1836_v19 }
 0x2e5   : > { %v2073_v13 = vpop.f32.mrf.mxu1 }
 0x2e6   : > { %v2072_v53 = vadd.f32 %v2071_v7, %v2053_v30 }
 0x2e9   : > { %v2014_v32 = vpop.f32.mrf.mxu2 }
 0x2ea   : > { %v2015_v57 = vadd.f32 %v2014_v32, %v1798_v9 }
 0x2eb   : > { %v2035_v58 = vpop.f32.mrf.mxu3  ;;  %v2054_v60 = vpop.f32.mrf.mxu0 }
 0x2ec   : > { %v2055_v63 = vadd.f32 %v2054_v60, %v1838_v48  ;;  %v2034_v38 = vadd.f32 %v2033_v43, %v2015_v57  ;;  %v1841_v43 = vadd.f32 %v1840_v37, %v1821_v47 }
 0x2ed   : > { %v2076_v49 = vpop.f32.mrf.mxu1 }
 0x2ee   : > { %v2074_v2 = vadd.f32 %v2073_v13, %v2055_v63 }
 0x2f1   : > { %v2016_v29 = vpop.f32.mrf.mxu2 }
 0x2f3   : > { %v4170_v4 = vpop.f32.mrf.mxu3  ;;  %v2057_v15 = vpop.f32.mrf.mxu0 }
 0x2f4   : > { %v2058_v30 = vadd.f32 %v2057_v15, %v1841_v43 }
 0x2f5   : > { %v4172_v5 = vpop.f32.mrf.mxu1 }
 0x2f9   : > { %v2019_v35 = vpop.f32.mrf.mxu2 }
 0x2fb   : > { %v4174_v27 = vpop.f32.mrf.mxu3  ;;  %v2059_v31 = vpop.f32.mrf.mxu0 }
 0x2fd   : > { %v2360_v50 = vpop.f32.mrf.mxu1 }
 0x301   : > { %v4176_v16 = vpop.f32.mrf.mxu2 }
 0x303   : > { %v2322_v26 = vpop.f32.mrf.mxu3  ;;  %v2341_v36 = vpop.f32.mrf.mxu0 }
 0x304   : > { %v2361_v59 = vadd.f32 %v2360_v50, %v2341_v36  ;;  %v2017_v50 = vadd.f32 %v2016_v29, %v1800_v42  ;;  %v1803_v29 = vadd.f32 %v4158_v41, %v4162_v17 }
 0x305   : > { %v2362_v46 = vpop.f32.mrf.mxu1 }
 0x306   : > { %v2371_v55 = vadd.f32 %v2361_v59, %v2072_v53  ;;  %v2036_v13 = vadd.f32 %v2035_v58, %v2017_v50  ;;  %v2077_v53 = vadd.f32 %v2076_v49, %v2058_v30  ;;  %v1843_v59 = vadd.f32 %v4160_v22, %v4166_v24 }
 0x307   : > { %v2020_v48 = vadd.f32 %v2019_v35, %v1803_v29  ;;  %v1805_v35 = vadd.f32 %v4164_v56, %v4168_v40 }
 0x308   : > { %v2385_v62 = vadd.f32 %v4181_v20, %v2371_v55  ;;  %v2060_v57 = vadd.f32 %v2059_v31, %v1843_v59 }
 0x309   : > { %v2303_v3 = vpop.f32.mrf.mxu2  ;;  %v2039_v55 = vadd.f32 %v4170_v4, %v2020_v48  ;;  %v2022_v4 = vadd.f32 %v4176_v16, %v1805_v35 }
 0x30a   : > { %v2393_v10 = vadd.f32 %v2385_v62, %v506_v12  ;;  %v2323_v19 = vadd.f32 %v2322_v26, %v2303_v3  ;;  %v2079_v31 = vadd.f32 %v4172_v5, %v2060_v57 }
 0x30b   : > { %v2343_v0 = vpop.f32.mrf.mxu0  ;;  %v2324_v60 = vpop.f32.mrf.mxu3 }
 0x30c   : > { %v2401_v51 = vmax.f32 %v2393_v10, 0.0  ;;  %v2370_v7 = vadd.f32 %v2323_v19, %v2034_v38  ;;  %v2363_v32 = vadd.f32 %v2362_v46, %v2343_v0  ;;  %v2041_v10 = vadd.f32 %v4174_v27, %v2022_v4 }
 0x30d   : > { %v2365_v21 = vpop.f32.mrf.mxu1 }
 0x30e   : > { %2409 = vst [vmem:[%s4192_s13 + $0x8] sm:$0xff] %v2401_v51  ;;  %v2384_v6 = vadd.f32 %v4187_v52, %v2370_v7  ;;  %v2373_v12 = vadd.f32 %v2363_v32, %v2074_v2 }
 0x310   : > { %v2392_v25 = vadd.f32 %v2384_v6, %v505_v11  ;;  %v2387_v26 = vadd.f32 %v4181_v20, %v2373_v12 }
 0x311   : > { %v2305_v44 = vpop.f32.mrf.mxu2 }
 0x312   : > { %v2400_v36 = vmax.f32 %v2392_v25, 0.0  ;;  %v2395_v37 = vadd.f32 %v2387_v26, %v508_v39  ;;  %v2325_v47 = vadd.f32 %v2324_v60, %v2305_v44 }
 0x313   : > { %v2346_v9 = vpop.f32.mrf.mxu0  ;;  %v2327_v39 = vpop.f32.mrf.mxu3 }
 0x314   : > { %2408 = vst [vmem:[%s4192_s13] sm:$0xff] %v2400_v36  ;;  %v2403_v15 = vmax.f32 %v2395_v37, 0.0  ;;  %v2372_v1 = vadd.f32 %v2325_v47, %v2036_v13  ;;  %v2366_v11 = vadd.f32 %v2365_v21, %v2346_v9 }
 0x315   : > { %v2367_v63 = vpop.f32.mrf.mxu1 }
 0x316   : > { %2411 = vst [vmem:[%s4192_s13 + $0x18] sm:$0xff] %v2403_v15  ;;  %v2386_v58 = vadd.f32 %v4187_v52, %v2372_v1  ;;  %v2375_v34 = vadd.f32 %v2366_v11, %v2077_v53 }
 0x318   : > { %v2394_v41 = vadd.f32 %v2386_v58, %v507_v33  ;;  %v2389_v17 = vadd.f32 %v4181_v20, %v2375_v34 }
 0x319   : > { %v2308_v49 = vpop.f32.mrf.mxu2 }
 0x31a   : > { %v2402_v46 = vmax.f32 %v2394_v41, 0.0  ;;  %v2397_v22 = vadd.f32 %v2389_v17, %v510_v23  ;;  %v2328_v24 = vadd.f32 %v2327_v39, %v2308_v49 }
 0x31b   : > { %v2348_v62 = vpop.f32.mrf.mxu0  ;;  %v2329_v38 = vpop.f32.mrf.mxu3 }
 0x31c   : > { %2410 = vst [vmem:[%s4192_s13 + $0x10] sm:$0xff] %v2402_v46  ;;  %v2405_v28 = vmax.f32 %v2397_v22, 0.0  ;;  %v2374_v33 = vadd.f32 %v2328_v24, %v2039_v55  ;;  %v2368_v3 = vadd.f32 %v2367_v63, %v2348_v62 }
 0x31e   : > { %2413 = vst [vmem:[%s4192_s13 + $0x28] sm:$0xff] %v2405_v28  ;;  %v2388_v14 = vadd.f32 %v4187_v52, %v2374_v33  ;;  %v2377_v23 = vadd.f32 %v2368_v3, %v2079_v31 }
 0x320   : > { %v2396_v56 = vadd.f32 %v2388_v14, %v509_v18  ;;  %v2391_v40 = vadd.f32 %v4181_v20, %v2377_v23 }
 0x321   : > { %v2310_v5 = vpop.f32.mrf.mxu2 }
 0x322   : > { %v2404_v19 = vmax.f32 %v2396_v56, 0.0  ;;  %v2399_v42 = vadd.f32 %v2391_v40, %v512_v61  ;;  %v2330_v0 = vadd.f32 %v2329_v38, %v2310_v5 }
 0x324   : > { %2412 = vst [vmem:[%s4192_s13 + $0x20] sm:$0xff] %v2404_v19  ;;  %v2407_v16 = vmax.f32 %v2399_v42, 0.0  ;;  %v2376_v2 = vadd.f32 %v2330_v0, %v2041_v10 }
 0x326   : > { %2415 = vst [vmem:[%s4192_s13 + $0x38] sm:$0xff] %v2407_v16  ;;  %v2390_v51 = vadd.f32 %v4187_v52, %v2376_v2 }
 0x328   : > { %v2398_v18 = vadd.f32 %v2390_v51, %v4249_v8 }
 0x32a   : > { %v2406_v7 = vmax.f32 %v2398_v18, 0.0 }
 0x32c   : > { %2414 = vst [vmem:[%s4192_s13 + $0x30] sm:$0xff] %v2406_v7 }
 0x32d PF: > { %s20_s27 = sadd.s32 1, %s3658_s27  }
 0x32e   : > { %p17_p7 = scmp.ge.s32.totalorder %s20_s27, 4  }
 0x330   :  { %19 = sbr.rel (!%p17_p7) target bundleno = 2 (0x2), region = 95 }
 0x335   :  { %2437 = vsyncpa [#allocation3], 1 }
 0x336   :  { %2439 = vsyncpa [#allocation3 + $0x1], 1 }
 0x337   :  { %2440 = vsyncpa [#allocation5], 1 }

</bundles_post_ra>
